<compile_context>
chip_gen: v7x
topology: tpu7x:2x2x1
jax: 0.10.0
libtpu: 0.0.40
codegen_flags: <defaults>
</compile_context>

<pallas_src>
import math
from functools import partial

import jax
import jax.numpy as jnp
from jax.experimental import pallas as pl
from jax.experimental.pallas import tpu as pltpu


def _layernorm(x2d, gamma, beta, eps):
    """LayerNorm exactly as the PyTorch module: unbiased std (ddof=1), divide by (std+eps)."""
    n = x2d.shape[-1]
    mean = jnp.mean(x2d, axis=-1, keepdims=True)
    var = jnp.sum((x2d - mean) ** 2, axis=-1, keepdims=True) * (1.0 / (n - 1))
    inv = 1.0 / (jnp.sqrt(var) + eps)          # compute once, multiply below
    return gamma * (x2d - mean) * inv + beta


def encoder_layer_kernel(
    x_ref,                        # (Bt, S, D)
    wqkv_ref,                     # (D, 3D)  fused Wq|Wk|Wv, pre-transposed for x @ W
    w1_ref, b1_ref,               # (D, F), (1, F)
    w2_ref, b2_ref,               # (F, D), (1, D)
    g1_ref, be1_ref,              # (1, D)  LayerNorm 1 gamma/beta
    g2_ref, be2_ref,              # (1, D)  LayerNorm 2 gamma/beta
    out_ref,                      # (Bt, S, D)
    *, mm_dtype,
):
    eps = 1e-6
    Bt, S, D = x_ref.shape
    c = lambda a: a.astype(mm_dtype)          # MXU-operand cast only (accum stays f32)

    # Fold (Bt, S) into the matmul M dimension.  All reshapes below only merge/split
    # LEADING dims (last dim unchanged) -> layout preserving on TPU.
    x2 = x_ref[...].reshape(Bt * S, D).astype(jnp.float32)

    # ---- Sublayer 0: x + SelfAttn(LayerNorm1(x)) ----
    n1 = _layernorm(x2, g1_ref[...], be1_ref[...], eps)

    qkv = jnp.dot(c(n1), c(wqkv_ref[...]),
                  preferred_element_type=jnp.float32)              # (Bt*S, 3D)
    q = qkv[:, 0 * D:1 * D].reshape(Bt, S, D)
    k = qkv[:, 1 * D:2 * D].reshape(Bt, S, D)
    v = qkv[:, 2 * D:3 * D].reshape(Bt, S, D)

    scale = 1.0 / math.sqrt(D)
    s = jnp.einsum("bqd,bkd->bqk", c(q), c(k),
                   preferred_element_type=jnp.float32) * scale      # (Bt, S, S)
    s = s - jnp.max(s, axis=-1, keepdims=True)
    p = jnp.exp(s)
    # approx=True -> EUP vrcp slot (otherwise idle), off the VALU divide path.
    p = p * pl.reciprocal(jnp.sum(p, axis=-1, keepdims=True), approx=True)
    attn = jnp.einsum("bqk,bkd->bqd", c(p), c(v),
                      preferred_element_type=jnp.float32)            # (Bt, S, D)

    x1 = x2 + attn.reshape(Bt * S, D)

    # ---- Sublayer 1: x1 + FFN(LayerNorm2(x1)) ----
    n2 = _layernorm(x1, g2_ref[...], be2_ref[...], eps)
    h = jnp.dot(c(n2), c(w1_ref[...]),
                preferred_element_type=jnp.float32) + b1_ref[...]    # (Bt*S, F)
    h = jnp.maximum(h, 0.0)
    ff = jnp.dot(c(h), c(w2_ref[...]),
                 preferred_element_type=jnp.float32) + b2_ref[...]   # (Bt*S, D)

    out_ref[...] = (x1 + ff).reshape(Bt, S, D).astype(out_ref.dtype)


def _pick_batch_tile(B, S):
    """Fold enough batch into one grid step to fill the MXU M dimension
    (Bt*S >= 128, ideally 256) while leaving >= 2 'parallel' grid steps when
    possible so v7x's two TensorCores both get work."""
    divisors = [d for d in range(1, B + 1) if B % d == 0]
    for target in (256, 128):
        cands = [d for d in divisors if d * S >= target and B // d >= 2]
        if cands:
            return cands[0]
    cands = [d for d in divisors if d * S >= 128]
    return cands[0] if cands else B


def encoder_layer(x, params, *, matmul_dtype=jnp.float32, batch_tile=None):
    """x: (B, S, D) float32.  params: dict of weights (see init_params)."""
    B, S, D = x.shape
    F = params["w1"].shape[1]
    Bt = batch_tile or _pick_batch_tile(B, S)
    assert B % Bt == 0, (B, Bt)
    grid = (B // Bt,)

    const2d = lambda shape: pl.BlockSpec(shape, lambda b: (0, 0))

    flops = (2 * B * S * D * 3 * D            # fused QKV projection
             + 2 * 2 * B * S * S * D          # q k^T and p v
             + 2 * 2 * B * S * D * F)         # two FFN matmuls
    bytes_accessed = 4 * (2 * B * S * D + 3 * D * D + 2 * D * F + F + 5 * D)

    return pl.pallas_call(
        partial(encoder_layer_kernel, mm_dtype=matmul_dtype),
        out_shape=jax.ShapeDtypeStruct((B, S, D), x.dtype),
        grid_spec=pltpu.PrefetchScalarGridSpec(
            num_scalar_prefetch=0,
            grid=grid,
            in_specs=[
                pl.BlockSpec((Bt, S, D), lambda b: (b, 0, 0)),   # x (batch-folded block)
                const2d((D, 3 * D)),                             # fused Wqkv
                const2d((D, F)), const2d((1, F)),                # W1^T, b1
                const2d((F, D)), const2d((1, D)),                # W2^T, b2
                const2d((1, D)), const2d((1, D)),                # ln1 gamma, beta
                const2d((1, D)), const2d((1, D)),                # ln2 gamma, beta
            ],
            out_specs=pl.BlockSpec((Bt, S, D), lambda b: (b, 0, 0)),
        ),
        compiler_params=pltpu.CompilerParams(
            dimension_semantics=("parallel",),
        ),
        cost_estimate=pl.CostEstimate(
            flops=flops,
            transcendentals=B * S * S,        # exp in softmax
            bytes_accessed=bytes_accessed,
        ),
    )(
        x,
        params["wqkv"],
        params["w1"], params["b1"],
        params["w2"], params["b2"],
        params["ln1_g"], params["ln1_b"],
        params["ln2_g"], params["ln2_b"],
    )


def init_params(key, d_model, d_ff):
    """Parameter init mirroring the module. Attention projections: xavier-uniform,
    no bias, fused into one (D, 3D) matrix. FFN linears: torch-default-ish with bias.
    LayerNorms: gamma=1, beta=0. Weights stored pre-transposed so kernels do y = x@W + b."""
    ks = jax.random.split(key, 8)

    def xavier(k, fan_in, fan_out):
        limit = math.sqrt(6.0 / (fan_in + fan_out))
        return jax.random.uniform(k, (fan_in, fan_out), jnp.float32, -limit, limit)

    def linear(kw, kb, fan_in, fan_out):
        bound = 1.0 / math.sqrt(fan_in)
        w = jax.random.uniform(kw, (fan_in, fan_out), jnp.float32, -bound, bound)
        b = jax.random.uniform(kb, (1, fan_out), jnp.float32, -bound, bound)
        return w, b

    wq = xavier(ks[0], d_model, d_model)
    wk = xavier(ks[1], d_model, d_model)
    wv = xavier(ks[2], d_model, d_model)
    wqkv = jnp.concatenate([wq, wk, wv], axis=1)       # (D, 3D) fused projection
    w1, b1 = linear(ks[3], ks[4], d_model, d_ff)
    w2, b2 = linear(ks[5], ks[6], d_ff, d_model)

    ones = jnp.ones((1, d_model), jnp.float32)
    zeros = jnp.zeros((1, d_model), jnp.float32)
    return dict(wqkv=wqkv, w1=w1, b1=b1, w2=w2, b2=b2,
                ln1_g=ones, ln1_b=zeros, ln2_g=ones, ln2_b=zeros)


def encoder_layer_ref(x, p):
    """Pure-JAX reference (PyTorch eval-mode semantics, exact softmax division)."""
    eps = 1e-6
    D = x.shape[-1]

    def ln(z, g, b):
        m = jnp.mean(z, axis=-1, keepdims=True)
        var = jnp.sum((z - m) ** 2, axis=-1, keepdims=True) / (D - 1)
        return g * (z - m) / (jnp.sqrt(var) + eps) + b

    wq = p["wqkv"][:, 0 * D:1 * D]
    wk = p["wqkv"][:, 1 * D:2 * D]
    wv = p["wqkv"][:, 2 * D:3 * D]
    n1 = ln(x, p["ln1_g"], p["ln1_b"])
    q = n1 @ wq; k = n1 @ wk; v = n1 @ wv
    s = (q @ jnp.swapaxes(k, -1, -2)) / math.sqrt(D)
    a = jax.nn.softmax(s, axis=-1) @ v
    x1 = x + a
    n2 = ln(x1, p["ln2_g"], p["ln2_b"])
    ff = jnp.maximum(n2 @ p["w1"] + p["b1"], 0.0) @ p["w2"] + p["b2"]
    return x1 + ff


if __name__ == "__main__":
    # 32 batches * 8 seq = 256 rows -> two parallel grid steps of M=128 each.
    B, S, D, F = 32, 8, 32, 64
    key = jax.random.PRNGKey(0)
    kx, kp = jax.random.split(key)
    x = jax.random.normal(kx, (B, S, D), jnp.float32)
    params = init_params(kp, D, F)

    out = jax.block_until_ready(encoder_layer(x, params))
    ref = encoder_layer_ref(x, params)

    assert out.shape == (B, S, D)
    max_err = float(jnp.max(jnp.abs(out - ref)))
    # f32 MXU accumulation throughout; the only approximation is the EUP
    # approx-reciprocal in the softmax denominator (typically <1e-3 absolute here).
    assert jnp.allclose(out, ref, atol=2e-2, rtol=2e-2), max_err
    print("KERNEL_OK")
</pallas_src>

<mosaic_0001>
module attributes {stable_mosaic.version = 11 : i64} {
  func.func @encoder_layer_kernel(%arg0: i32, %arg1: memref<16x8x32xf32, #tpu.memory_space<vmem>>, %arg2: memref<32x96xf32, #tpu.memory_space<vmem>>, %arg3: memref<32x64xf32, #tpu.memory_space<vmem>>, %arg4: memref<1x64xf32, #tpu.memory_space<vmem>>, %arg5: memref<64x32xf32, #tpu.memory_space<vmem>>, %arg6: memref<1x32xf32, #tpu.memory_space<vmem>>, %arg7: memref<1x32xf32, #tpu.memory_space<vmem>>, %arg8: memref<1x32xf32, #tpu.memory_space<vmem>>, %arg9: memref<1x32xf32, #tpu.memory_space<vmem>>, %arg10: memref<1x32xf32, #tpu.memory_space<vmem>>, %arg11: memref<16x8x32xf32, #tpu.memory_space<vmem>>) attributes {dimension_semantics = [#tpu.dimension_semantics<parallel>], iteration_bounds = array<i64: 2>, scalar_prefetch = 0 : i64, scratch_operands = 0 : i64, tpu.core_type = #tpu.core_type<tc>, window_params = [{transform_indices = @transform_0, window_bounds = array<i64: 16, 8, 32>}, {pipeline_mode = #tpu.pipeline_mode<synchronous>, transform_indices = @transform_1, window_bounds = array<i64: 32, 96>}, {pipeline_mode = #tpu.pipeline_mode<synchronous>, transform_indices = @transform_2, window_bounds = array<i64: 32, 64>}, {pipeline_mode = #tpu.pipeline_mode<synchronous>, transform_indices = @transform_3, window_bounds = array<i64: 1, 64>}, {pipeline_mode = #tpu.pipeline_mode<synchronous>, transform_indices = @transform_4, window_bounds = array<i64: 64, 32>}, {pipeline_mode = #tpu.pipeline_mode<synchronous>, transform_indices = @transform_5, window_bounds = array<i64: 1, 32>}, {pipeline_mode = #tpu.pipeline_mode<synchronous>, transform_indices = @transform_6, window_bounds = array<i64: 1, 32>}, {pipeline_mode = #tpu.pipeline_mode<synchronous>, transform_indices = @transform_7, window_bounds = array<i64: 1, 32>}, {pipeline_mode = #tpu.pipeline_mode<synchronous>, transform_indices = @transform_8, window_bounds = array<i64: 1, 32>}, {pipeline_mode = #tpu.pipeline_mode<synchronous>, transform_indices = @transform_9, window_bounds = array<i64: 1, 32>}, {transform_indices = @transform_10, window_bounds = array<i64: 16, 8, 32>}]} {
    %c0 = arith.constant 0 : index
    %c0_0 = arith.constant 0 : index
    %c0_1 = arith.constant 0 : index
    %0 = vector.load %arg1[%c0, %c0_0, %c0_1] : memref<16x8x32xf32, #tpu.memory_space<vmem>>, vector<16x8x32xf32>
    %1 = vector.shape_cast %0 : vector<16x8x32xf32> to vector<128x32xf32>
    %c0_2 = arith.constant 0 : index
    %c0_3 = arith.constant 0 : index
    %2 = vector.load %arg7[%c0_2, %c0_3] : memref<1x32xf32, #tpu.memory_space<vmem>>, vector<1x32xf32>
    %c0_4 = arith.constant 0 : index
    %c0_5 = arith.constant 0 : index
    %3 = vector.load %arg8[%c0_4, %c0_5] : memref<1x32xf32, #tpu.memory_space<vmem>>, vector<1x32xf32>
    %cst = arith.constant dense<0.000000e+00> : vector<128xf32>
    %4 = vector.multi_reduction <add>, %1, %cst [1] : vector<128x32xf32> to vector<128xf32>
    %5 = vector.shape_cast %4 : vector<128xf32> to vector<128x1xf32>
    %cst_6 = arith.constant 3.200000e+01 : f32
    %6 = vector.broadcast %cst_6 : f32 to vector<128x1xf32>
    %7 = arith.divf %5, %6 : vector<128x1xf32>
    %8 = vector.broadcast %7 : vector<128x1xf32> to vector<128x32xf32>
    %9 = arith.subf %1, %8 : vector<128x32xf32>
    %10 = arith.mulf %9, %9 : vector<128x32xf32>
    %cst_7 = arith.constant dense<0.000000e+00> : vector<128xf32>
    %11 = vector.multi_reduction <add>, %10, %cst_7 [1] : vector<128x32xf32> to vector<128xf32>
    %12 = vector.shape_cast %11 : vector<128xf32> to vector<128x1xf32>
    %cst_8 = arith.constant 0.0322580636 : f32
    %13 = vector.broadcast %cst_8 : f32 to vector<128x1xf32>
    %14 = arith.mulf %12, %13 : vector<128x1xf32>
    %15 = math.sqrt %14 : vector<128x1xf32>
    %cst_9 = arith.constant 9.99999997E-7 : f32
    %16 = vector.broadcast %cst_9 : f32 to vector<128x1xf32>
    %17 = arith.addf %15, %16 : vector<128x1xf32>
    %cst_10 = arith.constant 1.000000e+00 : f32
    %18 = vector.broadcast %cst_10 : f32 to vector<128x1xf32>
    %19 = arith.divf %18, %17 : vector<128x1xf32>
    %20 = vector.broadcast %7 : vector<128x1xf32> to vector<128x32xf32>
    %21 = arith.subf %1, %20 : vector<128x32xf32>
    %22 = vector.broadcast %2 : vector<1x32xf32> to vector<128x32xf32>
    %23 = arith.mulf %22, %21 : vector<128x32xf32>
    %24 = vector.broadcast %19 : vector<128x1xf32> to vector<128x32xf32>
    %25 = arith.mulf %23, %24 : vector<128x32xf32>
    %26 = vector.broadcast %3 : vector<1x32xf32> to vector<128x32xf32>
    %27 = arith.addf %25, %26 : vector<128x32xf32>
    %c0_11 = arith.constant 0 : index
    %c0_12 = arith.constant 0 : index
    %28 = vector.load %arg2[%c0_11, %c0_12] : memref<32x96xf32, #tpu.memory_space<vmem>>, vector<32x96xf32>
    %cst_13 = arith.constant dense<0.000000e+00> : vector<128x96xf32>
    %29 = tpu.matmul %27, %28, %cst_13 {dimension_numbers = #tpu.dot_dimension_numbers<[1], [0], [0], [1], [0, 0, 1, 1], [], []>} : vector<128x32xf32>, vector<32x96xf32>, vector<128x96xf32> -> vector<128x96xf32>
    %30 = vector.extract_strided_slice %29 {offsets = [0, 0], sizes = [128, 32], strides = [1, 1]} : vector<128x96xf32> to vector<128x32xf32>
    %31 = vector.shape_cast %30 : vector<128x32xf32> to vector<16x8x32xf32>
    %32 = vector.extract_strided_slice %29 {offsets = [0, 32], sizes = [128, 32], strides = [1, 1]} : vector<128x96xf32> to vector<128x32xf32>
    %33 = vector.shape_cast %32 : vector<128x32xf32> to vector<16x8x32xf32>
    %34 = vector.extract_strided_slice %29 {offsets = [0, 64], sizes = [128, 32], strides = [1, 1]} : vector<128x96xf32> to vector<128x32xf32>
    %35 = vector.shape_cast %34 : vector<128x32xf32> to vector<16x8x32xf32>
    "tpu.trace_start"() <{level = 10 : i32, message = "bqd,bkd->bqk"}> : () -> ()
    %cst_14 = arith.constant dense<0.000000e+00> : vector<16x8x8xf32>
    %36 = tpu.matmul %31, %33, %cst_14 {dimension_numbers = #tpu.dot_dimension_numbers<[2], [2], [1], [1], [0, 0, 0, 1, 1, 1], [0], [0]>} : vector<16x8x32xf32>, vector<16x8x32xf32>, vector<16x8x8xf32> -> vector<16x8x8xf32>
    "tpu.trace_stop"() : () -> ()
    %cst_15 = arith.constant 0.176776692 : f32
    %37 = vector.broadcast %cst_15 : f32 to vector<16x8x8xf32>
    %38 = arith.mulf %36, %37 : vector<16x8x8xf32>
    %cst_16 = arith.constant dense<0xFF800000> : vector<16x8xf32>
    %39 = vector.multi_reduction <maximumf>, %38, %cst_16 [2] : vector<16x8x8xf32> to vector<16x8xf32>
    %40 = vector.shape_cast %39 : vector<16x8xf32> to vector<16x8x1xf32>
    %41 = vector.broadcast %40 : vector<16x8x1xf32> to vector<16x8x8xf32>
    %42 = arith.subf %38, %41 : vector<16x8x8xf32>
    %43 = math.exp %42 : vector<16x8x8xf32>
    %cst_17 = arith.constant dense<0.000000e+00> : vector<16x8xf32>
    %44 = vector.multi_reduction <add>, %43, %cst_17 [2] : vector<16x8x8xf32> to vector<16x8xf32>
    %45 = vector.shape_cast %44 : vector<16x8xf32> to vector<16x8x1xf32>
    %46 = tpu.reciprocal %45 {approx = true} : vector<16x8x1xf32> -> vector<16x8x1xf32>
    %47 = vector.broadcast %46 : vector<16x8x1xf32> to vector<16x8x8xf32>
    %48 = arith.mulf %43, %47 : vector<16x8x8xf32>
    "tpu.trace_start"() <{level = 10 : i32, message = "bqk,bkd->bqd"}> : () -> ()
    %cst_18 = arith.constant dense<0.000000e+00> : vector<16x8x32xf32>
    %49 = tpu.matmul %48, %35, %cst_18 {dimension_numbers = #tpu.dot_dimension_numbers<[2], [1], [1], [2], [0, 0, 0, 1, 1, 2], [0], [0]>} : vector<16x8x8xf32>, vector<16x8x32xf32>, vector<16x8x32xf32> -> vector<16x8x32xf32>
    "tpu.trace_stop"() : () -> ()
    %50 = vector.shape_cast %49 : vector<16x8x32xf32> to vector<128x32xf32>
    %51 = arith.addf %1, %50 : vector<128x32xf32>
    %c0_19 = arith.constant 0 : index
    %c0_20 = arith.constant 0 : index
    %52 = vector.load %arg9[%c0_19, %c0_20] : memref<1x32xf32, #tpu.memory_space<vmem>>, vector<1x32xf32>
    %c0_21 = arith.constant 0 : index
    %c0_22 = arith.constant 0 : index
    %53 = vector.load %arg10[%c0_21, %c0_22] : memref<1x32xf32, #tpu.memory_space<vmem>>, vector<1x32xf32>
    %cst_23 = arith.constant dense<0.000000e+00> : vector<128xf32>
    %54 = vector.multi_reduction <add>, %51, %cst_23 [1] : vector<128x32xf32> to vector<128xf32>
    %55 = vector.shape_cast %54 : vector<128xf32> to vector<128x1xf32>
    %cst_24 = arith.constant 3.200000e+01 : f32
    %56 = vector.broadcast %cst_24 : f32 to vector<128x1xf32>
    %57 = arith.divf %55, %56 : vector<128x1xf32>
    %58 = vector.broadcast %57 : vector<128x1xf32> to vector<128x32xf32>
    %59 = arith.subf %51, %58 : vector<128x32xf32>
    %60 = arith.mulf %59, %59 : vector<128x32xf32>
    %cst_25 = arith.constant dense<0.000000e+00> : vector<128xf32>
    %61 = vector.multi_reduction <add>, %60, %cst_25 [1] : vector<128x32xf32> to vector<128xf32>
    %62 = vector.shape_cast %61 : vector<128xf32> to vector<128x1xf32>
    %cst_26 = arith.constant 0.0322580636 : f32
    %63 = vector.broadcast %cst_26 : f32 to vector<128x1xf32>
    %64 = arith.mulf %62, %63 : vector<128x1xf32>
    %65 = math.sqrt %64 : vector<128x1xf32>
    %cst_27 = arith.constant 9.99999997E-7 : f32
    %66 = vector.broadcast %cst_27 : f32 to vector<128x1xf32>
    %67 = arith.addf %65, %66 : vector<128x1xf32>
    %cst_28 = arith.constant 1.000000e+00 : f32
    %68 = vector.broadcast %cst_28 : f32 to vector<128x1xf32>
    %69 = arith.divf %68, %67 : vector<128x1xf32>
    %70 = vector.broadcast %57 : vector<128x1xf32> to vector<128x32xf32>
    %71 = arith.subf %51, %70 : vector<128x32xf32>
    %72 = vector.broadcast %52 : vector<1x32xf32> to vector<128x32xf32>
    %73 = arith.mulf %72, %71 : vector<128x32xf32>
    %74 = vector.broadcast %69 : vector<128x1xf32> to vector<128x32xf32>
    %75 = arith.mulf %73, %74 : vector<128x32xf32>
    %76 = vector.broadcast %53 : vector<1x32xf32> to vector<128x32xf32>
    %77 = arith.addf %75, %76 : vector<128x32xf32>
    %c0_29 = arith.constant 0 : index
    %c0_30 = arith.constant 0 : index
    %78 = vector.load %arg3[%c0_29, %c0_30] : memref<32x64xf32, #tpu.memory_space<vmem>>, vector<32x64xf32>
    %cst_31 = arith.constant dense<0.000000e+00> : vector<128x64xf32>
    %79 = tpu.matmul %77, %78, %cst_31 {dimension_numbers = #tpu.dot_dimension_numbers<[1], [0], [0], [1], [0, 0, 1, 1], [], []>} : vector<128x32xf32>, vector<32x64xf32>, vector<128x64xf32> -> vector<128x64xf32>
    %c0_32 = arith.constant 0 : index
    %c0_33 = arith.constant 0 : index
    %80 = vector.load %arg4[%c0_32, %c0_33] : memref<1x64xf32, #tpu.memory_space<vmem>>, vector<1x64xf32>
    %81 = vector.broadcast %80 : vector<1x64xf32> to vector<128x64xf32>
    %82 = arith.addf %79, %81 : vector<128x64xf32>
    %cst_34 = arith.constant 0.000000e+00 : f32
    %83 = vector.broadcast %cst_34 : f32 to vector<128x64xf32>
    %84 = arith.maximumf %82, %83 : vector<128x64xf32>
    %c0_35 = arith.constant 0 : index
    %c0_36 = arith.constant 0 : index
    %85 = vector.load %arg5[%c0_35, %c0_36] : memref<64x32xf32, #tpu.memory_space<vmem>>, vector<64x32xf32>
    %cst_37 = arith.constant dense<0.000000e+00> : vector<128x32xf32>
    %86 = tpu.matmul %84, %85, %cst_37 {dimension_numbers = #tpu.dot_dimension_numbers<[1], [0], [0], [1], [0, 0, 1, 1], [], []>} : vector<128x64xf32>, vector<64x32xf32>, vector<128x32xf32> -> vector<128x32xf32>
    %c0_38 = arith.constant 0 : index
    %c0_39 = arith.constant 0 : index
    %87 = vector.load %arg6[%c0_38, %c0_39] : memref<1x32xf32, #tpu.memory_space<vmem>>, vector<1x32xf32>
    %88 = vector.broadcast %87 : vector<1x32xf32> to vector<128x32xf32>
    %89 = arith.addf %86, %88 : vector<128x32xf32>
    %90 = arith.addf %51, %89 : vector<128x32xf32>
    %91 = vector.shape_cast %90 : vector<128x32xf32> to vector<16x8x32xf32>
    %c0_40 = arith.constant 0 : index
    %c0_41 = arith.constant 0 : index
    %c0_42 = arith.constant 0 : index
    %92 = vector.load %arg11[%c0_40, %c0_41, %c0_42] : memref<16x8x32xf32, #tpu.memory_space<vmem>>, vector<16x8x32xf32>
    tpu.vector_store %arg11[%c0_40, %c0_41, %c0_42], %91 {strides = array<i32>} : memref<16x8x32xf32, #tpu.memory_space<vmem>>, vector<16x8x32xf32>,
    return
  }
  func.func @transform_0(%arg0: i32) -> (i32, i32, i32) {
    %c0_i32 = arith.constant 0 : i32
    %c0_i32_0 = arith.constant 0 : i32
    %c0_i32_1 = arith.constant 0 : i32
    return %arg0, %c0_i32, %c0_i32_0 : i32, i32, i32
  }
  func.func @transform_1(%arg0: i32) -> (i32, i32) {
    %c0_i32 = arith.constant 0 : i32
    %c0_i32_0 = arith.constant 0 : i32
    %c0_i32_1 = arith.constant 0 : i32
    return %c0_i32, %c0_i32_0 : i32, i32
  }
  func.func @transform_2(%arg0: i32) -> (i32, i32) {
    %c0_i32 = arith.constant 0 : i32
    %c0_i32_0 = arith.constant 0 : i32
    %c0_i32_1 = arith.constant 0 : i32
    return %c0_i32, %c0_i32_0 : i32, i32
  }
  func.func @transform_3(%arg0: i32) -> (i32, i32) {
    %c0_i32 = arith.constant 0 : i32
    %c0_i32_0 = arith.constant 0 : i32
    %c0_i32_1 = arith.constant 0 : i32
    return %c0_i32, %c0_i32_0 : i32, i32
  }
  func.func @transform_4(%arg0: i32) -> (i32, i32) {
    %c0_i32 = arith.constant 0 : i32
    %c0_i32_0 = arith.constant 0 : i32
    %c0_i32_1 = arith.constant 0 : i32
    return %c0_i32, %c0_i32_0 : i32, i32
  }
  func.func @transform_5(%arg0: i32) -> (i32, i32) {
    %c0_i32 = arith.constant 0 : i32
    %c0_i32_0 = arith.constant 0 : i32
    %c0_i32_1 = arith.constant 0 : i32
    return %c0_i32, %c0_i32_0 : i32, i32
  }
  func.func @transform_6(%arg0: i32) -> (i32, i32) {
    %c0_i32 = arith.constant 0 : i32
    %c0_i32_0 = arith.constant 0 : i32
    %c0_i32_1 = arith.constant 0 : i32
    return %c0_i32, %c0_i32_0 : i32, i32
  }
  func.func @transform_7(%arg0: i32) -> (i32, i32) {
    %c0_i32 = arith.constant 0 : i32
    %c0_i32_0 = arith.constant 0 : i32
    %c0_i32_1 = arith.constant 0 : i32
    return %c0_i32, %c0_i32_0 : i32, i32
  }
  func.func @transform_8(%arg0: i32) -> (i32, i32) {
    %c0_i32 = arith.constant 0 : i32
    %c0_i32_0 = arith.constant 0 : i32
    %c0_i32_1 = arith.constant 0 : i32
    return %c0_i32, %c0_i32_0 : i32, i32
  }
  func.func @transform_9(%arg0: i32) -> (i32, i32) {
    %c0_i32 = arith.constant 0 : i32
    %c0_i32_0 = arith.constant 0 : i32
    %c0_i32_1 = arith.constant 0 : i32
    return %c0_i32, %c0_i32_0 : i32, i32
  }
  func.func @transform_10(%arg0: i32) -> (i32, i32, i32) {
    %c0_i32 = arith.constant 0 : i32
    %c0_i32_0 = arith.constant 0 : i32
    %c0_i32_1 = arith.constant 0 : i32
    return %arg0, %c0_i32, %c0_i32_0 : i32, i32, i32
  }
}

</mosaic_0001>

<bundles_post_ra>
// kernel: tpu_custom_call.1
= control target key start
LH: loop header
LB: loop body
LE: loop exit
PB: predicated region body
PF: predicated region fallthrough
CT: control target
= control target key end

     0   :  { %15 = vsyncpa [#allocation3], 0  ;;  %s6984_s0 = inlined_call_operand.hbm [shape: f32[32,8,32], index: 0, kind: input, shape index: {}]   ;;  %s6985_s1 = inlined_call_operand.vmem [shape: f32[32,96], index: 1, kind: input, shape index: {}]   ;;  %s6986_s2 = inlined_call_operand.vmem [shape: f32[32,64], index: 2, kind: input, shape index: {}]   ;;  %s6987_s3 = inlined_call_operand.vmem [shape: f32[1,64], index: 3, kind: input, shape index: {}]   ;;  %s6988_s4 = inlined_call_operand.vmem [shape: f32[64,32], index: 4, kind: input, shape index: {}]   ;;  %s6989_s5 = inlined_call_operand.vmem [shape: f32[1,32], index: 5, kind: input, shape index: {}]   ;;  %s6990_s6 = inlined_call_operand.vmem [shape: f32[1,32], index: 6, kind: input, shape index: {}]   ;;  %s6991_s7 = inlined_call_operand.vmem [shape: f32[1,32], index: 7, kind: input, shape index: {}]   ;;  %s6992_s8 = inlined_call_operand.vmem [shape: f32[1,32], index: 8, kind: input, shape index: {}]   ;;  %s6993_s9 = inlined_call_operand.vmem [shape: f32[1,32], index: 9, kind: input, shape index: {}]   ;;  %s6994_s10 = inlined_call_operand.hbm [shape: f32[32,8,32], index: 10, kind: output, shape index: {}]  }
   0x1   :  { %17 = vsyncpa [#allocation3 + $0x1], 0 }
   0x2   :  { %18 = vsyncpa [#allocation4], 0 }
   0x3   :  { %20 = vsyncpa [#allocation4 + $0x1], 0  ;;  %s5535_s13 = smov 0   ;;  %s5537_s14 = smov 0  }
   0x4   :  { %s5539_s15 = smov 0   ;;  %s5541_s16 = smov 0  }
   0x5 LB: > { %s5556_s17 = sadd.s32 4294967295, %s5468_s16   ;;  %s4564_s18 = sadd.s32 4294967294, %s5468_s16   ;;  %s5468_s16 = sphi %s5541_s16, %s7009_s16   ;;  %s5464_s15 = sphi %s5539_s15, %s7008_s15   ;;  %s5460_s14 = sphi %s5537_s14, %s7007_s14   ;;  %s5456_s13 = sphi %s5535_s13, %s7006_s13  }
   0x6   : > { %s5560_s19 = sadd.s32 1, %s5468_s16   ;;  %s33_s20 = sadd.s32 1, %s5464_s15 }
   0x7   : > { %s30_s21 = ssub.s32 %s5468_s16, %s5560_s19  ;;  %p40_p0 = scmp.ne.s32.totalorder %s5464_s15, %s5460_s14 }
   0x8   : > { %p31_p1 = scmp.eq.s32.totalorder %s30_s21, 0  ;;  %p41_p2 = scmp.eq.s32.totalorder %s5468_s16, 0 }
   0x9   : > { %p46_p3 = scmp.ne.s32.totalorder %s5460_s14, %s5456_s13  ;;  %p47_p4 = scmp.eq.s32.totalorder %s5556_s17, 0 }
   0xa   : > { %s5572_s22 = scalar_select %p31_p1, %s5464_s15, %s33_s20  }
   0xb   : > { %p5574_p5 = por %p41_p2, %p40_p0  ;;  %p5578_p6 = por %p47_p4, %p46_p3 }
   0xc   : > { %6996 = sst [smem:[#allocation8_spill]] %s5572_s22  ;;  %p259_p7 = scmp.eq.s32.totalorder %s5556_s17, 1 }
   0xd   : > { %p265_p8 = scmp.eq.s32.totalorder %s4564_s18, 1  ;;  %p5122_p10 = scmp.lt.s32.totalorder %s5468_s16, 2 }
   0xe   : > { %p5585_p11 = por %p259_p7, %p40_p0  ;;  %s312_s27 = sand.u32 1, %s5464_s15  }
   0xf   : > { %p5589_p12 = por %p265_p8, %p46_p3  ;;  %s4680_s28 = sshll.u32 %s5468_s16, 11 }
  0x10   : > { %s6999_s25 = scalar_select %p5585_p11, 1, 0 }
  0x11   : > { %s7000_s26 = scalar_select %p5589_p12, 1, 0 }
  0x12   : > { %s4567_s29 = sshll.u32 %s312_s27, 7  ;;  %s5598_s12 = scalar_lea.hbm %s6984_s0, %s4680_s28 }
  0x13   : > { %s316_s18 = scalar_lea.vmem [#allocation2], %s4567_s29  ;;  %p5602_p13 = pnand %p5122_p10, %p5574_p5 }
  0x14   : > { %s323_s20 = sshll.u32 %s316_s18, 4  ;;  %s5608_s22 = scalar_lea.sflag [#allocation3], %s312_s27  ;;  %s5606_s20 = int_to_ptr.vmem [resolvable:$true] %s323_s20 }
  0x15   : > { %s5372_s30 = scalar_lea.hbm %s5598_s12, 2048  ;;  %p5374_p1 = pneg %p5602_p13 }
  0x16   : > { %p5373_p0 = scmp.ne.s32.totalorder %s5598_s12, %s5372_s30  ;;  %s5377_s29 = scalar_lea.hbm %s6984_s0, 4096 }
  0x17   : > { %p5378_p4 = scmp.lt.u32.totalorder %s5598_s12, %s6984_s0  ;;  %p5379_p5 = scmp.lt.u32.totalorder %s5377_s29, %s5372_s30 }
  0x18   : > { %p5375_p2 = pnand %p5374_p1, %p5373_p0  ;;  %p5381_p8 = scmp.lt.u32.totalorder %s5372_s30, %s5598_s12 }
  0x19   : > { %p5380_p7 = por %p5379_p5, %p5378_p4 }
  0x1a   : > { %p5376_p3 = pneg %p5375_p2 }
  0x1b   : > { %p5382_p10 = por %p5381_p8, %p5380_p7 }
  0x1d   : > { %p5383_p9 = pnand %p5382_p10, %p5376_p3 }
  0x1f   : > { %5386 = shalt.err (!%p5383_p9)
}
  0x20   : > { %s5387_s27 = scalar_lea.vmem %s5606_s20, 2048  ;;  %s5470_s28 = smov [#allocation2]  }
  0x21   : > { %p5388_p0 = scmp.ne.s32.totalorder %s5606_s20, %s5387_s27  ;;  %s5392_s23 = sshll.u32 %s5470_s28, 4  ;;  %s5393_s23 = int_to_ptr.vmem [resolvable:$false] %s5392_s23 }
  0x22   : > { %s5394_s11 = scalar_lea.vmem %s5393_s23, 4096  ;;  %p5395_p11 = scmp.lt.s32.totalorder %s5606_s20, %s5393_s23 }
  0x23   : > { %p5390_p2 = pnand %p5388_p0, %p5374_p1  ;;  %p5396_p4 = scmp.lt.s32.totalorder %s5394_s11, %s5387_s27 }
  0x25   : > { %p5391_p12 = pneg %p5390_p2  ;;  %p5397_p5 = por %p5396_p4, %p5395_p11 }
  0x27   : > { %p5398_p7 = pnand %p5397_p5, %p5391_p12 }
  0x29   : > { %5401 = shalt.err (!%p5398_p7)
}
  0x2a   : > { %s5471_s30 = smov 128   ;;  %s5472_s29 = smov 8  }
  0x2b   : > { %5117 = dma.hbm_to_vmem [thread:$0]  (!%p5602_p13), %s5598_s12, 2048, %s5606_s20, %s5608_s22, %s5471_s30, %s5471_s30, %s5472_s29  }
  0x2c   : > { %p4570_p9 = scmp.ge.s32.totalorder %s5468_s16, 1  ;;  %p331_p1 = scmp.lt.s32.totalorder %s5468_s16, 3 }
  0x2e   : > { %p332_p3 = pnand %p4570_p9, %p331_p1 }
  0x2f   : > { %s5639_s18 = sand.u32 (!%p332_p3), 1, %s5460_s14  }
  0x30   : > { %335 = sbr.rel (%p332_p3) target bundleno = 2339 (0x923), region = 60  ;;  %s4571_s27 = sshll.u32 (!%p332_p3), %s5639_s18, 7 }
  0x31   : > { %s338_s28 = scalar_lea.sflag (!%p332_p3), [#allocation3], %s5639_s18  ;;  %s5645_s23 = scalar_lea.vmem (!%p332_p3), [#allocation2], %s4571_s27 }
  0x37   : > { %5447 = dma.done.wait (%p5578_p6), %s338_s28, 2048  }
  0x38   : > { %5449 = vsyncadd (%p5578_p6), %s338_s28, 4294965248  ;;  %vm398_vm0 = vcmask 261120   ;;  %v380_v0 = vld [vmem:[%s5645_s23] sm:$0xff]  ;;  %v382_v1 = vld [vmem:[%s5645_s23 + $0x10] sm:$0xff]  ;;  %s5475_s20 = smov 96   ;;  %s5476_s21 = smov 64  }
  0x39   : > { %v381_v2 = vld [vmem:[%s5645_s23 + $0x8] sm:$0xff]  ;;  %v399_v3 = vsel %vm398_vm0, %v380_v0, 0.0  ;;  %v405_v4 = vsel %vm398_vm0, %v382_v1, 0.0  ;;  %v383_v5 = vld [vmem:[%s5645_s23 + $0x18] sm:$0xff]  ;;  %v384_v8 = vld [vmem:[%s5645_s23 + $0x20] sm:$0xff]  ;;  %s6871_s30 = scalar_lea.vmem [#allocation5], %s4571_s27 }
  0x3a   : > { %400 = vadd.xlane.f32.xlu0 %v399_v3  ;;  %406 = vadd.xlane.f32.xlu1 %v405_v4  ;;  %v402_v6 = vsel %vm398_vm0, %v381_v2, 0.0  ;;  %v408_v7 = vsel %vm398_vm0, %v383_v5, 0.0  ;;  %v385_v9 = vld [vmem:[%s5645_s23 + $0x28] sm:$0xff]  ;;  %v411_v10 = vsel %vm398_vm0, %v384_v8, 0.0  ;;  %v5664_v12 = vld [vmem:[%s5645_s23 + $0x30] sm:$0xff]  ;;  %v5667_v13 = vld [vmem:[%s5645_s23 + $0x38] sm:$0xff] }
  0x3b   : > { %v414_v11 = vsel %vm398_vm0, %v385_v9, 0.0  ;;  %v417_v14 = vsel %vm398_vm0, %v5664_v12, 0.0  ;;  %v420_v15 = vsel %vm398_vm0, %v5667_v13, 0.0  ;;  %v5674_v16 = vld [vmem:[%s5645_s23 + $0x40] sm:$0xff]  ;;  %v5677_v17 = vld [vmem:[%s5645_s23 + $0x48] sm:$0xff]  ;;  %v5684_v20 = vld [vmem:[%s5645_s23 + $0x50] sm:$0xff] }
  0x3c   : > { %v423_v18 = vsel %vm398_vm0, %v5674_v16, 0.0  ;;  %v426_v19 = vsel %vm398_vm0, %v5677_v17, 0.0  ;;  %v5687_v21 = vld [vmem:[%s5645_s23 + $0x58] sm:$0xff]  ;;  %v429_v22 = vsel %vm398_vm0, %v5684_v20, 0.0  ;;  %v5694_v24 = vld [vmem:[%s5645_s23 + $0x60] sm:$0xff]  ;;  %v5697_v25 = vld [vmem:[%s5645_s23 + $0x68] sm:$0xff] }
  0x3d   : > { %v432_v23 = vsel %vm398_vm0, %v5687_v21, 0.0  ;;  %v435_v26 = vsel %vm398_vm0, %v5694_v24, 0.0  ;;  %v438_v27 = vsel %vm398_vm0, %v5697_v25, 0.0  ;;  %v5704_v28 = vld [vmem:[%s5645_s23 + $0x70] sm:$0xff]  ;;  %v5707_v29 = vld [vmem:[%s5645_s23 + $0x78] sm:$0xff]  ;;  %s4681_s27 = sshll.u32 %s5556_s17, 11 }
  0x3e   : > { %403 = vadd.xlane.f32.xlu0 %v402_v6  ;;  %409 = vadd.xlane.f32.xlu1 %v408_v7  ;;  %v441_v30 = vsel %vm398_vm0, %v5704_v28, 0.0  ;;  %v444_v31 = vsel %vm398_vm0, %v5707_v29, 0.0  ;;  %s4491_s29 = sshll.u32 %s6871_s30, 4  ;;  %s6933_s24 = scalar_lea.hbm %s6994_s10, %s4681_s27  ;;  %s6935_s29 = int_to_ptr.vmem [resolvable:$true] %s4491_s29 }
  0x3f   : > { %s4478_s17 = scalar_lea.sflag [#allocation4], %s5639_s18  ;;  %s5402_s12 = scalar_lea.vmem %s6935_s29, 2048 }
  0x40   : > { %p5403_p6 = scmp.ne.s32.totalorder %s6935_s29, %s5402_s12  ;;  %p7002_p11 = scmp.ne.s32.totalorder %s6999_s25, 0 }
  0x42   : > { %412 = vadd.xlane.f32.xlu0 %v411_v10  ;;  %415 = vadd.xlane.f32.xlu1 %v414_v11  ;;  %p5404_p12 = pnand %p5403_p6, %p7002_p11 }
  0x44   : > { %p5405_p13 = pneg %p5404_p12 }
  0x46   : > { %418 = vadd.xlane.f32.xlu0 %v417_v14  ;;  %421 = vadd.xlane.f32.xlu1 %v420_v15 }
  0x4a   : > { %424 = vadd.xlane.f32.xlu0 %v423_v18  ;;  %427 = vadd.xlane.f32.xlu1 %v426_v19 }
  0x4e   : > { %430 = vadd.xlane.f32.xlu0 %v429_v22  ;;  %433 = vadd.xlane.f32.xlu1 %v432_v23 }
  0x52   : > { %436 = vadd.xlane.f32.xlu0 %v435_v26  ;;  %439 = vadd.xlane.f32.xlu1 %v438_v27 }
  0x56   : > { %442 = vadd.xlane.f32.xlu0 %v441_v30  ;;  %445 = vadd.xlane.f32.xlu1 %v444_v31 }
  0xc7   : > { %v401_v32 = vpop.xlane.xlu0 %400  ;;  %v407_v33 = vpop.xlane.xlu1 %406 }
  0xc8   : > { %v448_v34 = vmul.f32 0.03125, %v401_v32  ;;  %v450_v35 = vmul.f32 0.03125, %v407_v33 }
  0xca   : > { %v5713_v36 = vsub.f32 %v380_v0, %v448_v34  ;;  %v5715_v37 = vsub.f32 %v382_v1, %v450_v35 }
  0xcb   : > { %v404_v38 = vpop.xlane.xlu0 %403  ;;  %v410_v39 = vpop.xlane.xlu1 %409 }
  0xcc   : > { %v449_v40 = vmul.f32 0.03125, %v404_v38  ;;  %v451_v41 = vmul.f32 0.03125, %v410_v39  ;;  %v480_v42 = vmul.f32 %v5713_v36, %v5713_v36  ;;  %v482_v43 = vmul.f32 %v5715_v37, %v5715_v37 }
  0xce   : > { %v5721_v44 = vsub.f32 %v381_v2, %v449_v40  ;;  %v5723_v45 = vsub.f32 %v383_v5, %v451_v41  ;;  %v496_v46 = vsel %vm398_vm0, %v480_v42, 0.0  ;;  %v502_v51 = vsel %vm398_vm0, %v482_v43, 0.0 }
  0xcf   : > { %497 = vadd.xlane.f32.xlu0 %v496_v46  ;;  %v413_v47 = vpop.xlane.xlu0 %412  ;;  %v416_v48 = vpop.xlane.xlu1 %415 }
  0xd0   : > { %v452_v49 = vmul.f32 0.03125, %v413_v47  ;;  %v453_v50 = vmul.f32 0.03125, %v416_v48  ;;  %v481_v52 = vmul.f32 %v5721_v44, %v5721_v44  ;;  %v483_v53 = vmul.f32 %v5723_v45, %v5723_v45 }
  0xd2   : > { %v5731_v54 = vsub.f32 %v384_v8, %v452_v49  ;;  %v5733_v55 = vsub.f32 %v385_v9, %v453_v50  ;;  %v499_v56 = vsel %vm398_vm0, %v481_v52, 0.0  ;;  %v505_v61 = vsel %vm398_vm0, %v483_v53, 0.0  ;;  %v781_v53 = vld [vmem:[%s6985_s1 + $0x8] sm:$0xff] }
  0xd3   : > { %503 = vadd.xlane.f32.xlu0 %v502_v51  ;;  %v419_v57 = vpop.xlane.xlu0 %418  ;;  %v422_v58 = vpop.xlane.xlu1 %421  ;;  %500 = vadd.xlane.f32.xlu1 %v499_v56 }
  0xd4   : > { %v454_v59 = vmul.f32 0.03125, %v419_v57  ;;  %v455_v60 = vmul.f32 0.03125, %v422_v58  ;;  %v484_v62 = vmul.f32 %v5731_v54, %v5731_v54  ;;  %v485_v63 = vmul.f32 %v5733_v55, %v5733_v55  ;;  %v782_v57 = vld [vmem:[%s6985_s1 + $0x10] sm:$0xff]  ;;  %v783_v58 = vld [vmem:[%s6985_s1 + $0x18] sm:$0xff] }
  0xd6   : > { %v5742_v0 = vsub.f32 %v5664_v12, %v454_v59  ;;  %v5745_v1 = vsub.f32 %v5667_v13, %v455_v60  ;;  %v508_v2 = vsel %vm398_vm0, %v484_v62, 0.0  ;;  %v511_v7 = vsel %vm398_vm0, %v485_v63, 0.0 }
  0xd7   : > { %v425_v3 = vpop.xlane.xlu0 %424  ;;  %v428_v4 = vpop.xlane.xlu1 %427  ;;  %506 = vadd.xlane.f32.xlu1 %v505_v61  ;;  %509 = vadd.xlane.f32.xlu0 %v508_v2  ;;  %v5078_v59 = vpack.c.bf16 %v783_v58, %v782_v57 }
  0xd8   : > { %v456_v5 = vmul.f32 0.03125, %v425_v3  ;;  %v457_v6 = vmul.f32 0.03125, %v428_v4  ;;  %v486_v8 = vmul.f32 %v5742_v0, %v5742_v0  ;;  %v487_v9 = vmul.f32 %v5745_v1, %v5745_v1 }
  0xda   : > { %v5754_v10 = vsub.f32 %v5674_v16, %v456_v5  ;;  %v5757_v11 = vsub.f32 %v5677_v17, %v457_v6  ;;  %v514_v12 = vsel %vm398_vm0, %v486_v8, 0.0  ;;  %v517_v19 = vsel %vm398_vm0, %v487_v9, 0.0  ;;  %v5828_v8 = vld [vmem:[%s6990_s6] ss:$0 sm:$0xff] }
  0xdb   : > { %v431_v13 = vpop.xlane.xlu0 %430  ;;  %v434_v14 = vpop.xlane.xlu1 %433  ;;  %512 = vadd.xlane.f32.xlu1 %v511_v7  ;;  %515 = vadd.xlane.f32.xlu0 %v514_v12 }
  0xdc   : > { %v458_v15 = vmul.f32 0.03125, %v431_v13  ;;  %v459_v18 = vmul.f32 0.03125, %v434_v14  ;;  %v488_v22 = vmul.f32 %v5754_v10, %v5754_v10  ;;  %v489_v16 = vmul.f32 %v5757_v11, %v5757_v11 }
  0xde   : > { %v5766_v23 = vsub.f32 %v5684_v20, %v458_v15  ;;  %v5769_v17 = vsub.f32 %v5687_v21, %v459_v18  ;;  %v520_v26 = vsel %vm398_vm0, %v488_v22, 0.0  ;;  %v523_v33 = vsel %vm398_vm0, %v489_v16, 0.0 }
  0xdf   : > { %v437_v27 = vpop.xlane.xlu0 %436  ;;  %v440_v30 = vpop.xlane.xlu1 %439  ;;  %518 = vadd.xlane.f32.xlu1 %v517_v19  ;;  %521 = vadd.xlane.f32.xlu0 %v520_v26  ;;  %v5838_v19 = vmul.f32 %v5828_v8, %v5715_v37  ;;  %v5842_v22 = vmul.f32 %v5828_v8, %v5713_v36  ;;  %v5846_v16 = vmul.f32 %v5828_v8, %v5721_v44 }
  0xe0   : > { %v460_v31 = vmul.f32 0.03125, %v437_v27  ;;  %v461_v32 = vmul.f32 0.03125, %v440_v30  ;;  %v490_v34 = vmul.f32 %v5766_v23, %v5766_v23  ;;  %v491_v20 = vmul.f32 %v5769_v17, %v5769_v17 }
  0xe1   : > { %v5850_v26 = vmul.f32 %v5828_v8, %v5723_v45  ;;  %v5854_v27 = vmul.f32 %v5828_v8, %v5731_v54  ;;  %v5859_v30 = vmul.f32 %v5828_v8, %v5733_v55 }
  0xe2   : > { %v5778_v35 = vsub.f32 %v5694_v24, %v460_v31  ;;  %v5781_v21 = vsub.f32 %v5697_v25, %v461_v32  ;;  %v526_v38 = vsel %vm398_vm0, %v490_v34, 0.0  ;;  %v529_v43 = vsel %vm398_vm0, %v491_v20, 0.0 }
  0xe3   : > { %v443_v39 = vpop.xlane.xlu0 %442  ;;  %v446_v40 = vpop.xlane.xlu1 %445  ;;  %524 = vadd.xlane.f32.xlu1 %v523_v33  ;;  %527 = vadd.xlane.f32.xlu0 %v526_v38 }
  0xe4   : > { %v462_v41 = vmul.f32 0.03125, %v443_v39  ;;  %v463_v42 = vmul.f32 0.03125, %v446_v40  ;;  %v492_v46 = vmul.f32 %v5778_v35, %v5778_v35  ;;  %v493_v24 = vmul.f32 %v5781_v21, %v5781_v21 }
  0xe6   : > { %v5790_v47 = vsub.f32 %v5704_v28, %v462_v41  ;;  %v5793_v25 = vsub.f32 %v5707_v29, %v463_v42  ;;  %v532_v48 = vsel %vm398_vm0, %v492_v46, 0.0  ;;  %v535_v50 = vsel %vm398_vm0, %v493_v24, 0.0  ;;  %v780_v29 = vld [vmem:[%s6985_s1] sm:$0xff] }
  0xe7   : > { %530 = vadd.xlane.f32.xlu1 %v529_v43  ;;  %533 = vadd.xlane.f32.xlu0 %v532_v48  ;;  %v5074_v56 = vpack.c.bf16 %v781_v53, %v780_v29 }
  0xe8   : > { %v494_v49 = vmul.f32 %v5790_v47, %v5790_v47  ;;  %v495_v51 = vmul.f32 %v5793_v25, %v5793_v25 }
  0xe9   : > { %5075 = vmatprep.subr.bf16.mxu0 %v5074_v56  ;;  %5106 = vmatprep.subr.bf16.mxu1 %v5074_v56 }
  0xea   : > { %v538_v52 = vsel %vm398_vm0, %v494_v49, 0.0  ;;  %v541_v28 = vsel %vm398_vm0, %v495_v51, 0.0  ;;  %5077 = vmatpush3.bf16.msra.mxu0 %v5074_v56  ;;  %5108 = vmatpush3.bf16.msra.mxu1 %v5074_v56 }
  0xeb   : > { %536 = vadd.xlane.f32.xlu1 %v535_v50  ;;  %539 = vadd.xlane.f32.xlu0 %v538_v52 }
  0xec   : > { %5079 = vmatprep.subr.bf16.mxu0 %v5078_v59  ;;  %5107 = vmatprep.subr.bf16.mxu1 %v5078_v59 }
  0xee   : > { %5081 = vmatpush3.bf16.msra.mxu0 %v5078_v59  ;;  %5109 = vmatpush3.bf16.msra.mxu1 %v5078_v59 }
  0xef   : > { %542 = vadd.xlane.f32.xlu1 %v541_v28 }
 0x15c   : > { %v498_v60 = vpop.xlane.xlu0 %497 }
 0x15d   : > { %v544_v61 = vmul.f32 0.032258064, %v498_v60 }
 0x15f   : > { %5164 = vrsqrt.f32 %v544_v61  ;;  %vm562_vm1 = vcmp.eq.f32.partialorder %v544_v61, inf  ;;  %vm564_vm2 = vcmp.eq.f32.partialorder %v544_v61, 0.0  ;;  %v565_v33 = vand.u32 2147483648, %v544_v61 }
 0x160   : > { %v504_v62 = vpop.xlane.xlu0 %503  ;;  %v501_v63 = vpop.xlane.xlu1 %500 }
 0x161   : > { %v5815_v2 = vmul.f32 0.032258064, %v504_v62  ;;  %v5817_v3 = vmul.f32 0.032258064, %v501_v63 }
 0x163   : > { %5166 = vrsqrt.f32 %v5815_v2  ;;  %vm576_vm3 = vcmp.eq.f32.partialorder %v5815_v2, inf  ;;  %vm578_vm4 = vcmp.eq.f32.partialorder %v5815_v2, 0.0  ;;  %v579_v55 = vand.u32 2147483648, %v5815_v2 }
 0x164   : > { %5168 = vrsqrt.f32 %v5817_v3  ;;  %v507_v4 = vpop.xlane.xlu1 %506  ;;  %v510_v5 = vpop.xlane.xlu0 %509  ;;  %vm569_vm5 = vcmp.eq.f32.partialorder %v5817_v3, inf  ;;  %vm571_vm6 = vcmp.eq.f32.partialorder %v5817_v3, 0.0  ;;  %v572_v39 = vand.u32 2147483648, %v5817_v3 }
 0x165   : > { %v5821_v6 = vmul.f32 0.032258064, %v507_v4  ;;  %v5823_v7 = vmul.f32 0.032258064, %v510_v5 }
 0x167   : > { %5170 = vrsqrt.f32 %v5821_v6  ;;  %vm583_vm7 = vcmp.eq.f32.partialorder %v5821_v6, inf  ;;  %v586_v46 = vand.u32 2147483648, %v5821_v6  ;;  %vm590_vm8 = vcmp.eq.f32.partialorder %v5823_v7, inf }
 0x168   : > { %5172 = vrsqrt.f32 %v5823_v7  ;;  %v513_v12 = vpop.xlane.xlu1 %512  ;;  %v516_v13 = vpop.xlane.xlu0 %515  ;;  %v593_v50 = vand.u32 2147483648, %v5823_v7  ;;  %vm585_vm11 = vcmp.eq.f32.partialorder %v5821_v6, 0.0  ;;  %vm592_vm12 = vcmp.eq.f32.partialorder %v5823_v7, 0.0 }
 0x169   : > { %v5165_v9 = vpop.eup %5164  ;;  %v5832_v15 = vmul.f32 0.032258064, %v513_v12  ;;  %v5834_v18 = vmul.f32 0.032258064, %v516_v13 }
 0x16a   : > { %v561_v14 = vmul.f32 %v5165_v9, %v544_v61 }
 0x16b   : > { %5174 = vrsqrt.f32 %v5832_v15  ;;  %vm597_vm9 = vcmp.eq.f32.partialorder %v5832_v15, inf  ;;  %v600_v52 = vand.u32 2147483648, %v5832_v15  ;;  %vm604_vm10 = vcmp.eq.f32.partialorder %v5834_v18, inf }
 0x16c   : > { %5176 = vrsqrt.f32 %v5834_v18  ;;  %v519_v36 = vpop.xlane.xlu1 %518  ;;  %v522_v44 = vpop.xlane.xlu0 %521  ;;  %v563_v54 = vsel %vm562_vm1, %v544_v61, %v561_v14  ;;  %v607_v56 = vand.u32 2147483648, %v5834_v18  ;;  %vm599_vm13 = vcmp.eq.f32.partialorder %v5832_v15, 0.0 }
 0x16d   : > { %v5167_v37 = vpop.eup %5166  ;;  %v5862_v45 = vmul.f32 0.032258064, %v519_v36  ;;  %v5864_v32 = vmul.f32 0.032258064, %v522_v44  ;;  %v566_v20 = vsel %vm564_vm2, %v565_v33, %v563_v54  ;;  %vm606_vm2 = vcmp.eq.f32.partialorder %v5834_v18, 0.0 }
 0x16e   : > { %v5169_v31 = vpop.eup %5168  ;;  %v575_v40 = vmul.f32 %v5167_v37, %v5815_v2  ;;  %v672_v51 = vadd.f32 1e-06, %v566_v20 }
 0x16f   : > { %v568_v34 = vmul.f32 %v5169_v31, %v5817_v3  ;;  %5178 = vrsqrt.f32 %v5862_v45  ;;  %vm611_vm14 = vcmp.eq.f32.partialorder %v5862_v45, inf  ;;  %v614_v61 = vand.u32 2147483648, %v5862_v45 }
 0x170   : > { %5180 = vrsqrt.f32 %v5864_v32  ;;  %v525_v41 = vpop.xlane.xlu1 %524  ;;  %v528_v42 = vpop.xlane.xlu0 %527  ;;  %v577_v29 = vsel %vm576_vm3, %v5815_v2, %v575_v40  ;;  %vm618_vm15 = vcmp.eq.f32.partialorder %v5864_v32, inf  ;;  %vm613_vm3 = vcmp.eq.f32.partialorder %v5862_v45, 0.0 }
 0x171   : > { %v570_v38 = vsel %vm569_vm5, %v5817_v3, %v568_v34  ;;  %v5171_v43 = vpop.eup %5170  ;;  %v5879_v24 = vmul.f32 0.032258064, %v525_v41  ;;  %v5881_v48 = vmul.f32 0.032258064, %v528_v42  ;;  %v621_v3 = vand.u32 2147483648, %v5864_v32 }
 0x172   : > { %v5173_v49 = vpop.eup %5172  ;;  %v573_v28 = vsel %vm571_vm6, %v572_v39, %v570_v38  ;;  %v582_v53 = vmul.f32 %v5171_v43, %v5821_v6  ;;  %v580_v12 = vsel %vm578_vm4, %v579_v55, %v577_v29  ;;  %vm620_vm5 = vcmp.eq.f32.partialorder %v5864_v32, 0.0 }
 0x173   : > { %5182 = vrsqrt.f32 %v5879_v24  ;;  %v589_v60 = vmul.f32 %v5173_v49, %v5823_v7  ;;  %v673_v5 = vadd.f32 1e-06, %v573_v28  ;;  %vm625_vm1 = vcmp.eq.f32.partialorder %v5879_v24, inf }
 0x174   : > { %5184 = vrsqrt.f32 %v5881_v48  ;;  %v531_v57 = vpop.xlane.xlu1 %530  ;;  %v534_v58 = vpop.xlane.xlu0 %533  ;;  %v584_v13 = vsel %vm583_vm7, %v5821_v6, %v582_v53  ;;  %v628_v37 = vand.u32 2147483648, %v5879_v24  ;;  %vm632_vm4 = vcmp.eq.f32.partialorder %v5881_v48, inf }
 0x175   : > { %v5175_v59 = vpop.eup %5174  ;;  %v5903_v62 = vmul.f32 0.032258064, %v531_v57  ;;  %v5907_v4 = vmul.f32 0.032258064, %v534_v58  ;;  %5186 = vrcp.f32 %v672_v51  ;;  %v591_v2 = vsel %vm590_vm8, %v5823_v7, %v589_v60  ;;  %v5978_v7 = vld [vmem:[%s6991_s7] ss:$0 sm:$0xff] }
 0x176   : > { %v5177_v63 = vpop.eup %5176  ;;  %v596_v9 = vmul.f32 %v5175_v59, %v5832_v15  ;;  %v635_v54 = vand.u32 2147483648, %v5881_v48  ;;  %v674_v38 = vadd.f32 1e-06, %v580_v12  ;;  %vm627_vm6 = vcmp.eq.f32.partialorder %v5879_v24, 0.0 }
 0x177   : > { %5188 = vrsqrt.f32 %v5903_v62  ;;  %v603_v14 = vmul.f32 %v5177_v63, %v5834_v18  ;;  %vm639_vm7 = vcmp.eq.f32.partialorder %v5903_v62, inf  ;;  %v642_v42 = vand.u32 2147483648, %v5903_v62 }
 0x178   : > { %5190 = vrsqrt.f32 %v5907_v4  ;;  %v537_v36 = vpop.xlane.xlu1 %536  ;;  %v540_v44 = vpop.xlane.xlu0 %539  ;;  %v598_v39 = vsel %vm597_vm9, %v5832_v15, %v596_v9  ;;  %vm646_vm8 = vcmp.eq.f32.partialorder %v5907_v4, inf  ;;  %vm634_vm9 = vcmp.eq.f32.partialorder %v5881_v48, 0.0 }
 0x179   : > { %v5179_v31 = vpop.eup %5178  ;;  %v5927_v33 = vmul.f32 0.032258064, %v537_v36  ;;  %v5930_v20 = vmul.f32 0.032258064, %v540_v44  ;;  %5192 = vrcp.f32 %v673_v5  ;;  %v605_v41 = vsel %vm604_vm10, %v5834_v18, %v603_v14 }
 0x17a   : > { %v5181_v34 = vpop.eup %5180  ;;  %v610_v55 = vmul.f32 %v5179_v31, %v5862_v45  ;;  %v649_v28 = vand.u32 2147483648, %v5907_v4  ;;  %vm648_vm10 = vcmp.eq.f32.partialorder %v5907_v4, 0.0  ;;  %v587_v58 = vsel %vm585_vm11, %v586_v46, %v584_v13 }
 0x17b   : > { %v617_v40 = vmul.f32 %v5181_v34, %v5864_v32  ;;  %5194 = vrsqrt.f32 %v5927_v33  ;;  %v594_v59 = vsel %vm592_vm12, %v593_v50, %v591_v2  ;;  %v601_v60 = vsel %vm599_vm13, %v600_v52, %v598_v39 }
 0x17c   : > { %5196 = vrsqrt.f32 %v5930_v20  ;;  %v543_v43 = vpop.xlane.xlu1 %542  ;;  %v612_v51 = vsel %vm611_vm14, %v5862_v45, %v610_v55  ;;  %vm641_vm14 = vcmp.eq.f32.partialorder %v5903_v62, 0.0  ;;  %vm653_vm11 = vcmp.eq.f32.partialorder %v5927_v33, inf }
 0x17d   : > { %v5183_v49 = vpop.eup %5182  ;;  %v5951_v29 = vmul.f32 0.032258064, %v543_v43  ;;  %5198 = vrcp.f32 %v674_v38  ;;  %v619_v63 = vsel %vm618_vm15, %v5864_v32, %v617_v40  ;;  %v656_v6 = vand.u32 2147483648, %v5927_v33 }
 0x17e   : > { %v5185_v53 = vpop.eup %5184  ;;  %v624_v57 = vmul.f32 %v5183_v49, %v5879_v24  ;;  %vm655_vm12 = vcmp.eq.f32.partialorder %v5927_v33, 0.0  ;;  %vm660_vm13 = vcmp.eq.f32.partialorder %v5930_v20, inf  ;;  %v663_v50 = vand.u32 2147483648, %v5930_v20 }
 0x17f   : > { %v631_v5 = vmul.f32 %v5185_v53, %v5881_v48  ;;  %5200 = vrsqrt.f32 %v5951_v29  ;;  %v5187_v15 = vpop.eup %5186  ;;  %v675_v52 = vadd.f32 1e-06, %v587_v58  ;;  %v676_v9 = vadd.f32 1e-06, %v594_v59 }
 0x180   : > { %v626_v46 = vsel %vm625_vm1, %v5879_v24, %v624_v57  ;;  %v742_v14 = vmul.f32 %v5187_v15, %v5842_v22  ;;  %v677_v36 = vadd.f32 1e-06, %v601_v60  ;;  %v608_v44 = vsel %vm606_vm2, %v607_v56, %v605_v41 }
 0x181   : > { %v5189_v12 = vpop.eup %5188  ;;  %v633_v13 = vsel %vm632_vm4, %v5881_v48, %v631_v5  ;;  %5202 = vrcp.f32 %v675_v52  ;;  %v678_v34 = vadd.f32 1e-06, %v608_v44  ;;  %v615_v55 = vsel %vm613_vm3, %v614_v61, %v612_v51 }
 0x182   : > { %v5191_v31 = vpop.eup %5190  ;;  %v638_v2 = vmul.f32 %v5189_v12, %v5903_v62  ;;  %v764_v22 = vadd.f32 %v5978_v7, %v742_v14  ;;  %5204 = vrcp.f32 %v676_v9  ;;  %v679_v39 = vadd.f32 1e-06, %v615_v55 }
 0x183   : > { %v645_v38 = vmul.f32 %v5191_v31, %v5907_v4  ;;  %v5193_v40 = vpop.eup %5192  ;;  %5206 = vrcp.f32 %v677_v36  ;;  %v622_v56 = vsel %vm620_vm5, %v621_v3, %v619_v63  ;;  %v629_v45 = vsel %vm627_vm6, %v628_v37, %v626_v46 }
 0x184   : > { %v640_v18 = vsel %vm639_vm7, %v5903_v62, %v638_v2  ;;  %4818 = vmatprep.mubr.msk.f32.mxu0 %vm398_vm0, %v764_v22  ;;  %v743_v43 = vmul.f32 %v5193_v40, %v5846_v16  ;;  %5208 = vrcp.f32 %v678_v34  ;;  %v680_v49 = vadd.f32 1e-06, %v622_v56 }
 0x185   : > { %v5195_v61 = vpop.eup %5194  ;;  %v647_v41 = vsel %vm646_vm8, %v5907_v4, %v645_v38  ;;  %5210 = vrcp.f32 %v679_v39  ;;  %v681_v3 = vadd.f32 1e-06, %v629_v45  ;;  %v636_v24 = vsel %vm634_vm9, %v635_v54, %v633_v13 }
 0x186   : > { %v5197_v51 = vpop.eup %5196  ;;  %v652_v32 = vmul.f32 %v5195_v61, %v5927_v33  ;;  %v765_v57 = vadd.f32 %v5978_v7, %v743_v43  ;;  %5212 = vrcp.f32 %v680_v49  ;;  %v682_v58 = vadd.f32 1e-06, %v636_v24 }
 0x187   : > { %v5199_v37 = vpop.eup %5198  ;;  %v659_v53 = vmul.f32 %v5197_v51, %v5930_v20  ;;  %5214 = vrcp.f32 %v681_v3  ;;  %v643_v48 = vsel %vm641_vm14, %v642_v42, %v640_v18  ;;  %v650_v63 = vsel %vm648_vm10, %v649_v28, %v647_v41 }
 0x188   : > { %v654_v16 = vsel %vm653_vm11, %v5927_v33, %v652_v32  ;;  %v744_v59 = vmul.f32 %v5199_v37, %v5838_v19  ;;  %4819 = vmatmul.mubr.msk.f32.vlgmr.msra.gmra.mrb[0].mxu0 %vm398_vm0, %v765_v57  ;;  %5216 = vrcp.f32 %v682_v58  ;;  %v683_v60 = vadd.f32 1e-06, %v643_v48 }
 0x189   : > { %v5201_v54 = vpop.eup %5200  ;;  %v657_v5 = vsel %vm655_vm12, %v656_v6, %v654_v16  ;;  %v684_v46 = vadd.f32 1e-06, %v650_v63  ;;  %vm667_vm15 = vcmp.eq.f32.partialorder %v5951_v29, inf  ;;  %v670_v42 = vand.u32 2147483648, %v5951_v29 }
 0x18a   : > { %v666_v19 = vmul.f32 %v5201_v54, %v5951_v29  ;;  %v766_v15 = vadd.f32 %v5978_v7, %v744_v59  ;;  %v685_v62 = vadd.f32 1e-06, %v657_v5  ;;  %v661_v52 = vsel %vm660_vm13, %v5930_v20, %v659_v53 }
 0x18b   : > { %vm662_vm1 = vcmp.eq.f32.partialorder %v5930_v20, 0.0  ;;  %v5203_v4 = vpop.eup %5202  ;;  %vm669_vm2 = vcmp.eq.f32.partialorder %v5951_v29, 0.0  ;;  %5218 = vrcp.f32 %v683_v60  ;;  %v732_v36 = vmul.f32 %v5828_v8, %v5742_v0 }
 0x18c   : > { %v668_v33 = vsel %vm667_vm15, %v5951_v29, %v666_v19  ;;  %4821 = vmatprep.mubr.msk.f32.mxu0 %vm398_vm0, %v766_v15  ;;  %v664_v28 = vsel %vm662_vm1, %v663_v50, %v661_v52  ;;  %v5205_v6 = vpop.eup %5204  ;;  %v745_v12 = vmul.f32 %v5203_v4, %v5850_v26  ;;  %5220 = vrcp.f32 %v684_v46 }
 0x18d   : > { %v671_v9 = vsel %vm669_vm2, %v670_v42, %v668_v33  ;;  %v686_v13 = vadd.f32 1e-06, %v664_v28  ;;  %v5207_v14 = vpop.eup %5206  ;;  %v746_v20 = vmul.f32 %v5205_v6, %v5854_v27  ;;  %5222 = vrcp.f32 %v685_v62 }
 0x18e   : > { %v687_v44 = vadd.f32 1e-06, %v671_v9  ;;  %v5209_v31 = vpop.eup %5208  ;;  %v733_v29 = vmul.f32 %v5828_v8, %v5745_v1  ;;  %v767_v50 = vadd.f32 %v5978_v7, %v745_v12  ;;  %v747_v2 = vmul.f32 %v5207_v14, %v5859_v30 }
 0x18f   : > { %5224 = vrcp.f32 %v686_v13  ;;  %v5211_v26 = vpop.eup %5210  ;;  %v734_v34 = vmul.f32 %v5828_v8, %v5754_v10  ;;  %v768_v55 = vadd.f32 %v5978_v7, %v746_v20  ;;  %v748_v0 = vmul.f32 %v5209_v31, %v732_v36 }
 0x190   : > { %5226 = vrcp.f32 %v687_v44  ;;  %v5213_v27 = vpop.eup %5212  ;;  %4822 = vmatmul.mubr.msk.f32.gmra.mrb[2].mxu0 %vm398_vm0, %v767_v50  ;;  %v769_v38 = vadd.f32 %v5978_v7, %v747_v2  ;;  %v749_v22 = vmul.f32 %v5211_v26, %v733_v29  ;;  %v735_v10 = vmul.f32 %v5828_v8, %v5757_v11 }
 0x191   : > { %v5215_v1 = vpop.eup %5214  ;;  %4824 = vmatprep.mubr.msk.f32.mxu0 %vm398_vm0, %v768_v55  ;;  %v770_v30 = vadd.f32 %v5978_v7, %v748_v0  ;;  %v750_v39 = vmul.f32 %v5213_v27, %v734_v34  ;;  %v736_v18 = vmul.f32 %v5828_v8, %v5766_v23  ;;  %v737_v51 = vmul.f32 %v5828_v8, %v5769_v17 }
 0x192   : > { %v5217_v40 = vpop.eup %5216  ;;  %v771_v56 = vadd.f32 %v5978_v7, %v749_v22  ;;  %v751_v45 = vmul.f32 %v5215_v1, %v735_v10  ;;  %v738_v11 = vmul.f32 %v5828_v8, %v5778_v35  ;;  %v740_v23 = vmul.f32 %v5828_v8, %v5790_v47 }
 0x193   : > { %v772_v41 = vadd.f32 %v5978_v7, %v750_v39  ;;  %v752_v43 = vmul.f32 %v5217_v40, %v736_v18  ;;  %v741_v24 = vmul.f32 %v5828_v8, %v5793_v25  ;;  %v739_v35 = vmul.f32 %v5828_v8, %v5781_v21 }
 0x194   : > { %4825 = vmatmul.mubr.msk.f32.gmra.mrb[4].mxu0 %vm398_vm0, %v769_v38  ;;  %v773_v37 = vadd.f32 %v5978_v7, %v751_v45  ;;  %v5473_v8 = vmov 0.0   ;;  %vm5474_vm3 = vmmov 0   ;;  %vm2225_vm4 = vcmask 64512  }
 0x195   : > { %v5219_v61 = vpop.eup %5218  ;;  %4827 = vmatprep.mubr.msk.f32.mxu0 %vm398_vm0, %v770_v30  ;;  %v774_v17 = vadd.f32 %v5978_v7, %v752_v43  ;;  %4842 = vmatprep.subr.mxu1 %v5473_v8 }
 0x196   : > { %v5221_v49 = vpop.eup %5220  ;;  %v753_v53 = vmul.f32 %v5219_v61, %v737_v51  ;;  %4887 = vmatprep.subr.mxu0 %v5473_v8 }
 0x197   : > { %v5223_v32 = vpop.eup %5222  ;;  %v754_v58 = vmul.f32 %v5221_v49, %v738_v11 }
 0x198   : > { %4828 = vmatmul.mubr.msk.f32.gmra.mrb[6].mxu0 %vm398_vm0, %v771_v56  ;;  %v775_v25 = vadd.f32 %v5978_v7, %v753_v53  ;;  %v755_v48 = vmul.f32 %v5223_v32, %v739_v35 }
 0x199   : > { %v5225_v3 = vpop.eup %5224  ;;  %4830 = vmatprep.mubr.msk.f32.mxu0 %vm398_vm0, %v772_v41  ;;  %v776_v60 = vadd.f32 %v5978_v7, %v754_v58 }
 0x19a   : > { %v5227_v57 = vpop.eup %5226  ;;  %v756_v16 = vmul.f32 %v5225_v3, %v740_v23  ;;  %v777_v21 = vadd.f32 %v5978_v7, %v755_v48 }
 0x19b   : > { %v757_v47 = vmul.f32 %v5227_v57, %v741_v24 }
 0x19c   : > { %v778_v59 = vadd.f32 %v5978_v7, %v756_v16  ;;  %4831 = vmatmul.mubr.msk.f32.gmra.mrb[8].mxu0 %vm398_vm0, %v773_v37 }
 0x19d   : > { %v779_v54 = vadd.f32 %v5978_v7, %v757_v47  ;;  %4833 = vmatprep.mubr.msk.f32.mxu0 %vm398_vm0, %v774_v17 }
 0x19e   : > { %4839 = vmatprep.mubr.msk.f32.mxu1 %vm398_vm0, %v778_v59 }
 0x19f   : > { %4840 = vmatmul.mubr.msk.f32.vlgmr.msra.gmra.mrb[0].mxu1 %vm398_vm0, %v779_v54 }
 0x1a0   : > { %4834 = vmatmul.mubr.msk.f32.gmra.mrb[10].mxu0 %vm398_vm0, %v775_v25  ;;  %4844 = vmatprep.mubr.msk.f32.mxu1 %vm5474_vm3, %v5473_v8 }
 0x1a1   : > { %4836 = vmatprep.mubr.msk.f32.mxu0 %vm398_vm0, %v776_v60 }
 0x1a4   : > { %4837 = vmatmul.mubr.msk.f32.gmra.mrb[12].mxu0 %vm398_vm0, %v777_v21 }
 0x1a5   : > { %4889 = vmatprep.mubr.msk.f32.mxu0 %vm5474_vm3, %v5473_v8 }
 0x25b   : > { %v4820_v63 = vpop.f32.mrb[0].mxu0 }
 0x25c   : > { %1055 = vrot.lane.b32.xlu1 %v4820_v63, %s5475_s20  ;;  %v898_v7 = vpop.f32.mrb[1].mxu0 }
 0x25d   : > { %978 = vrot.lane.b32.xlu0 %v898_v7, %s5475_s20 }
 0x263   : > { %v4823_v5 = vpop.f32.mrb[2].mxu0 }
 0x264   : > { %v908_v19 = vpop.f32.mrb[3].mxu0 }
 0x265   : > { %1132 = vrot.lane.b32.xlu1 %v908_v19, %s5475_s20 }
 0x267   : > { %v6108_v15 = vpop.f32.mrb[4].mxu0 }
 0x268   : > { %v918_v46 = vpop.f32.mrb[5].mxu0 }
 0x269   : > { %1209 = vrot.lane.b32.xlu1 %v4823_v5, %s5475_s20  ;;  %1286 = vrot.lane.b32.xlu0 %v918_v46, %s5475_s20 }
 0x26b   : > { %v6112_v62 = vpop.f32.mrb[6].mxu0 }
 0x26c   : > { %v6114_v42 = vpop.f32.mrb[7].mxu0 }
 0x26d   : > { %1363 = vrot.lane.b32.xlu1 %v6108_v15, %s5475_s20  ;;  %1440 = vrot.lane.b32.xlu0 %v6114_v42, %s5475_s20 }
 0x26f   : > { %v6120_v52 = vpop.f32.mrb[8].mxu0 }
 0x270   : > { %v6122_v4 = vpop.f32.mrb[9].mxu0 }
 0x271   : > { %1517 = vrot.lane.b32.xlu1 %v6112_v62, %s5475_s20  ;;  %1594 = vrot.lane.b32.xlu0 %v6122_v4, %s5475_s20 }
 0x272   : > { %v6128_v33 = vpop.f32.mrb[0].mxu1 }
 0x273   : > { %v6130_v28 = vpop.f32.mrb[1].mxu1  ;;  %v6132_v6 = vpop.f32.mrb[10].mxu0 }
 0x274   : > { %v6134_v9 = vpop.f32.mrb[11].mxu0 }
 0x275   : > { %1671 = vrot.lane.b32.xlu1 %v6120_v52, %s5475_s20  ;;  %1748 = vrot.lane.b32.xlu0 %v6134_v9, %s5475_s20 }
 0x277   : > { %v6140_v12 = vpop.f32.mrb[12].mxu0 }
 0x278   : > { %v6142_v13 = vpop.f32.mrb[13].mxu0 }
 0x279   : > { %1825 = vrot.lane.b32.xlu1 %v6132_v6, %s5475_s20  ;;  %1902 = vrot.lane.b32.xlu0 %v6142_v13, %s5475_s20 }
 0x27d   : > { %1979 = vrot.lane.b32.xlu1 %v6140_v12, %s5475_s20  ;;  %2056 = vrot.lane.b32.xlu0 %v6130_v28, %s5475_s20 }
 0x281   : > { %2133 = vrot.lane.b32.xlu1 %v6128_v33, %s5475_s20  ;;  %2402 = vrot.lane.b32.xlu0 %v898_v7, %s5476_s21  ;;  %s5477_s20 = smov [#allocation5]  }
 0x285   : > { %2478 = vrot.lane.b32.xlu1 %v4820_v63, %s5476_s21  ;;  %2554 = vrot.lane.b32.xlu0 %v908_v19, %s5476_s21 }
 0x289   : > { %2630 = vrot.lane.b32.xlu1 %v4823_v5, %s5476_s21  ;;  %2858 = vrot.lane.b32.xlu0 %v6114_v42, %s5476_s21 }
 0x28d   : > { %2706 = vrot.lane.b32.xlu1 %v918_v46, %s5476_s21  ;;  %3010 = vrot.lane.b32.xlu0 %v6122_v4, %s5476_s21 }
 0x291   : > { %2782 = vrot.lane.b32.xlu1 %v6108_v15, %s5476_s21 }
 0x295   : > { %2934 = vrot.lane.b32.xlu1 %v6112_v62, %s5476_s21 }
 0x299   : > { %3086 = vrot.lane.b32.xlu1 %v6120_v52, %s5476_s21 }
 0x2ce   : > { %v1056_v36 = vpop.permute.xlu1 %1055 }
 0x2cf   : > { %v979_v14 = vpop.permute.xlu0 %978 }
 0x2d0   : > { %4843 = vmatpush3.xpose.msk.msra.mxu1 %vm398_vm0, %v979_v14 }
 0x2d1   : > { %4847 = vmatprep.subr.mxu1 %v5473_v8 }
 0x2d3   : > { %4845 = vmatmul.mubr.msk.f32.vlgmr.msra.gmra.mrb[2].mxu1 %vm398_vm0, %v898_v7 }
 0x2d4   : > { %4848 = vmatpush3.xpose.msk.msra.mxu1 %vm398_vm0, %v1056_v36  ;;  %4849 = vmatprep.mubr.msk.f32.mxu1 %vm5474_vm3, %v5473_v8 }
 0x2d5   : > { %4852 = vmatprep.subr.mxu1 %v5473_v8 }
 0x2d7   : > { %v1133_v20 = vpop.permute.xlu1 %1132  ;;  %4850 = vmatmul.mubr.msk.f32.vlgmr.msra.gmra.mrb[4].mxu1 %vm398_vm0, %v4820_v63 }
 0x2d8   : > { %4853 = vmatpush3.xpose.msk.msra.mxu1 %vm398_vm0, %v1133_v20  ;;  %4854 = vmatprep.mubr.msk.f32.mxu1 %vm5474_vm3, %v5473_v8 }
 0x2d9   : > { %4857 = vmatprep.subr.mxu1 %v5473_v8 }
 0x2db   : > { %v1210_v44 = vpop.permute.xlu1 %1209  ;;  %4855 = vmatmul.mubr.msk.f32.vlgmr.msra.gmra.mrb[6].mxu1 %vm398_vm0, %v908_v19  ;;  %v1287_v31 = vpop.permute.xlu0 %1286 }
 0x2dc   : > { %4858 = vmatpush3.xpose.msk.msra.mxu1 %vm398_vm0, %v1210_v44  ;;  %4859 = vmatprep.mubr.msk.f32.mxu1 %vm5474_vm3, %v5473_v8 }
 0x2dd   : > { %4862 = vmatprep.subr.mxu1 %v5473_v8 }
 0x2df   : > { %v1364_v29 = vpop.permute.xlu1 %1363  ;;  %4860 = vmatmul.mubr.msk.f32.vlgmr.msra.gmra.mrb[8].mxu1 %vm398_vm0, %v4823_v5  ;;  %v1441_v50 = vpop.permute.xlu0 %1440 }
 0x2e0   : > { %4863 = vmatpush3.xpose.msk.msra.mxu1 %vm398_vm0, %v1287_v31  ;;  %4864 = vmatprep.mubr.msk.f32.mxu1 %vm5474_vm3, %v5473_v8 }
 0x2e1   : > { %4867 = vmatprep.subr.mxu1 %v5473_v8 }
 0x2e3   : > { %v1518_v2 = vpop.permute.xlu1 %1517  ;;  %4865 = vmatmul.mubr.msk.f32.vlgmr.msra.gmra.mrb[10].mxu1 %vm398_vm0, %v918_v46  ;;  %v1595_v34 = vpop.permute.xlu0 %1594 }
 0x2e4   : > { %4868 = vmatpush3.xpose.msk.msra.mxu1 %vm398_vm0, %v1364_v29  ;;  %4869 = vmatprep.mubr.msk.f32.mxu1 %vm5474_vm3, %v5473_v8 }
 0x2e5   : > { %4872 = vmatprep.subr.mxu1 %v5473_v8 }
 0x2e7   : > { %v1672_v26 = vpop.permute.xlu1 %1671  ;;  %4870 = vmatmul.mubr.msk.f32.vlgmr.msra.gmra.mrb[12].mxu1 %vm398_vm0, %v6108_v15  ;;  %v1749_v0 = vpop.permute.xlu0 %1748 }
 0x2e8   : > { %4888 = vmatpush3.xpose.msk.msra.mxu0 %vm398_vm0, %v1672_v26  ;;  %4873 = vmatpush3.xpose.msk.msra.mxu1 %vm398_vm0, %v1441_v50 }
 0x2e9   : > { %4897 = vmatprep.subr.mxu0 %v5473_v8  ;;  %4874 = vmatprep.mubr.msk.f32.mxu1 %vm5474_vm3, %v5473_v8 }
 0x2ea   : > { %4877 = vmatprep.subr.mxu1 %v5473_v8 }
 0x2eb   : > { %v1826_v55 = vpop.permute.xlu1 %1825  ;;  %4890 = vmatmul.mubr.msk.f32.vlgmr.msra.gmra.mrb[14].mxu0 %vm398_vm0, %v6120_v52  ;;  %4875 = vmatmul.mubr.msk.f32.vlgmr.msra.gmra.mrb[14].mxu1 %vm398_vm0, %v6114_v42  ;;  %v1903_v22 = vpop.permute.xlu0 %1902 }
 0x2ec   : > { %4898 = vmatpush3.xpose.msk.msra.mxu0 %vm398_vm0, %v1826_v55  ;;  %4899 = vmatprep.mubr.msk.f32.mxu0 %vm5474_vm3, %v5473_v8 }
 0x2ed   : > { %4907 = vmatprep.subr.mxu0 %v5473_v8  ;;  %4878 = vmatpush3.xpose.msk.msra.mxu1 %vm398_vm0, %v1518_v2 }
 0x2ee   : > { %4879 = vmatprep.mubr.msk.f32.mxu1 %vm5474_vm3, %v5473_v8  ;;  %4882 = vmatprep.subr.mxu1 %v5473_v8 }
 0x2ef   : > { %4900 = vmatmul.mubr.msk.f32.vlgmr.msra.gmra.mrb[16].mxu0 %vm398_vm0, %v6132_v6  ;;  %v1980_v27 = vpop.permute.xlu1 %1979  ;;  %v2057_v30 = vpop.permute.xlu0 %2056 }
 0x2f0   : > { %4908 = vmatpush3.xpose.msk.msra.mxu0 %vm398_vm0, %v1980_v27  ;;  %4909 = vmatprep.mubr.msk.f32.mxu0 %vm5474_vm3, %v5473_v8 }
 0x2f1   : > { %4917 = vmatprep.subr.mxu0 %v5473_v8  ;;  %4880 = vmatmul.mubr.msk.f32.vlgmr.msra.gmra.mrb[16].mxu1 %vm398_vm0, %v6112_v62 }
 0x2f2   : > { %4883 = vmatpush3.xpose.msk.msra.mxu1 %vm398_vm0, %v1595_v34  ;;  %4884 = vmatprep.mubr.msk.f32.mxu1 %vm5474_vm3, %v5473_v8 }
 0x2f3   : > { %4910 = vmatmul.mubr.msk.f32.vlgmr.msra.gmra.mrb[18].mxu0 %vm398_vm0, %v6140_v12  ;;  %v2134_v38 = vpop.permute.xlu1 %2133  ;;  %4892 = vmatprep.subr.mxu1 %v5473_v8  ;;  %v2403_v39 = vpop.permute.xlu0 %2402 }
 0x2f4   : > { %4918 = vmatpush3.xpose.msk.msra.mxu0 %vm398_vm0, %v2134_v38  ;;  %4919 = vmatprep.mubr.msk.f32.mxu0 %vm5474_vm3, %v5473_v8 }
 0x2f5   : > { %4927 = vmatprep.subr.mxu0 %v5473_v8  ;;  %4885 = vmatmul.mubr.msk.f32.vlgmr.msra.gmra.mrb[18].mxu1 %vm398_vm0, %v6122_v4 }
 0x2f6   : > { %4893 = vmatpush3.xpose.msk.msra.mxu1 %vm398_vm0, %v1749_v0  ;;  %4894 = vmatprep.mubr.msk.f32.mxu1 %vm5474_vm3, %v5473_v8 }
 0x2f7   : > { %4920 = vmatmul.mubr.msk.f32.vlgmr.msra.gmra.mrb[20].mxu0 %vm398_vm0, %v6128_v33  ;;  %v2479_v1 = vpop.permute.xlu1 %2478  ;;  %4902 = vmatprep.subr.mxu1 %v5473_v8 }
 0x2f8   : > { %4928 = vmatpush3.msra.mxu0 %v2479_v1  ;;  %4929 = vmatprep.mubr.msk.f32.mxu0 %vm5474_vm3, %v5473_v8 }
 0x2f9   : > { %4895 = vmatmul.mubr.msk.f32.vlgmr.msra.gmra.mrb[20].mxu1 %vm398_vm0, %v6134_v9  ;;  %4937 = vmatprep.subr.mxu0 %v5473_v8 }
 0x2fa   : > { %4903 = vmatpush3.xpose.msk.msra.mxu1 %vm398_vm0, %v1903_v22  ;;  %4904 = vmatprep.mubr.msk.f32.mxu1 %vm5474_vm3, %v5473_v8 }
 0x2fb   : > { %4912 = vmatprep.subr.mxu1 %v5473_v8 }
 0x2fd   : > { %4905 = vmatmul.mubr.msk.f32.vlgmr.msra.gmra.mrb[22].mxu1 %vm398_vm0, %v6142_v13 }
 0x2fe   : > { %4913 = vmatpush3.xpose.msk.msra.mxu1 %vm398_vm0, %v2057_v30  ;;  %4914 = vmatprep.mubr.msk.f32.mxu1 %vm5474_vm3, %v5473_v8 }
 0x2ff   : > { %4922 = vmatprep.subr.mxu1 %v5473_v8 }
 0x301   : > { %4915 = vmatmul.mubr.msk.f32.vlgmr.msra.gmra.mrb[24].mxu1 %vm398_vm0, %v6130_v28 }
 0x302   : > { %4923 = vmatpush3.msra.mxu1 %v2403_v39  ;;  %4924 = vmatprep.mubr.msk.f32.mxu1 %vm5474_vm3, %v5473_v8 }
 0x303   : > { %4932 = vmatprep.subr.mxu1 %v5473_v8 }
 0x3a6   : > { %v1050_v40 = vpop.f32.mrb[2].mxu1 }
 0x3a7   : > { %v6262_v10 = vmul.f32 0.17677669, %v1050_v40  ;;  %v4846_v18 = vpop.f32.mrb[3].mxu1 }
 0x3a9   : > { %v2226_v56 = vsel %vm2225_vm4, %v6262_v10, -inf }
 0x3aa   : > { %2227 = vmax.xlane.f32.xlu0 %v2226_v56  ;;  %v1127_v45 = vpop.f32.mrb[4].mxu1 }
 0x3ab   : > { %v6266_v61 = vmul.f32 0.17677669, %v1127_v45  ;;  %v4851_v41 = vpop.f32.mrb[5].mxu1 }
 0x3ad   : > { %v2229_v43 = vsel %vm2225_vm4, %v6266_v61, -inf }
 0x3ae   : > { %2230 = vmax.xlane.f32.xlu1 %v2229_v43  ;;  %v1204_v49 = vpop.f32.mrb[6].mxu1 }
 0x3af   : > { %v6270_v51 = vmul.f32 0.17677669, %v1204_v49  ;;  %v4856_v32 = vpop.f32.mrb[7].mxu1 }
 0x3b0   : > { %v6332_v32 = vpop.permute.xlu1 %2630 }
 0x3b1   : > { %v2232_v11 = vsel %vm2225_vm4, %v6270_v51, -inf }
 0x3b2   : > { %2233 = vmax.xlane.f32.xlu0 %v2232_v11  ;;  %v1281_v23 = vpop.f32.mrb[8].mxu1 }
 0x3b3   : > { %v6274_v3 = vmul.f32 0.17677669, %v1281_v23  ;;  %v4861_v24 = vpop.f32.mrb[9].mxu1  ;;  %v6336_v23 = vpop.permute.xlu0 %2554 }
 0x3b4   : > { %v6334_v11 = vpop.permute.xlu1 %2706 }
 0x3b5   : > { %v2235_v37 = vsel %vm2225_vm4, %v6274_v3, -inf }
 0x3b6   : > { %2236 = vmax.xlane.f32.xlu0 %v2235_v37  ;;  %v1358_v53 = vpop.f32.mrb[10].mxu1 }
 0x3b7   : > { %v6278_v57 = vmul.f32 0.17677669, %v1358_v53  ;;  %v4866_v17 = vpop.f32.mrb[11].mxu1  ;;  %v6340_v37 = vpop.permute.xlu0 %2858 }
 0x3b8   : > { %v6338_v24 = vpop.permute.xlu1 %2782 }
 0x3b9   : > { %v2238_v58 = vsel %vm2225_vm4, %v6278_v57, -inf }
 0x3ba   : > { %2239 = vmax.xlane.f32.xlu0 %v2238_v58  ;;  %v1435_v16 = vpop.f32.mrb[12].mxu1 }
 0x3bb   : > { %v4871_v35 = vpop.f32.mrb[13].mxu1  ;;  %v6292_v46 = vmul.f32 0.17677669, %v1435_v16  ;;  %v6344_v17 = vpop.permute.xlu0 %3010 }
 0x3bc   : > { %v6342_v53 = vpop.permute.xlu1 %2934 }
 0x3bd   : > { %v2241_v20 = vsel %vm2225_vm4, %v6292_v46, -inf }
 0x3be   : > { %v1743_v47 = vpop.f32.mrb[14].mxu0  ;;  %v1512_v59 = vpop.f32.mrb[14].mxu1 }
 0x3bf   : > { %v6282_v25 = vmul.f32 0.17677669, %v1743_v47  ;;  %v4891_v48 = vpop.f32.mrb[15].mxu0  ;;  %v6284_v54 = vmul.f32 0.17677669, %v1512_v59  ;;  %v4876_v60 = vpop.f32.mrb[15].mxu1 }
 0x3c1   : > { %v2253_v21 = vsel %vm2225_vm4, %v6282_v25, -inf  ;;  %v2244_v63 = vsel %vm2225_vm4, %v6284_v54, -inf }
 0x3c2   : > { %v1897_v7 = vpop.f32.mrb[16].mxu0  ;;  %2254 = vmax.xlane.f32.xlu1 %v2253_v21  ;;  %2245 = vmax.xlane.f32.xlu0 %v2244_v63 }
 0x3c3   : > { %v6290_v5 = vmul.f32 0.17677669, %v1897_v7  ;;  %v4901_v19 = vpop.f32.mrb[17].mxu0 }
 0x3c4   : > { %v1589_v15 = vpop.f32.mrb[16].mxu1 }
 0x3c5   : > { %v2259_v62 = vsel %vm2225_vm4, %v6290_v5, -inf  ;;  %v4881_v42 = vpop.f32.mrb[17].mxu1  ;;  %v6312_v1 = vmul.f32 0.17677669, %v1589_v15 }
 0x3c6   : > { %v2051_v52 = vpop.f32.mrb[18].mxu0  ;;  %2260 = vmax.xlane.f32.xlu1 %v2259_v62 }
 0x3c7   : > { %v4911_v4 = vpop.f32.mrb[19].mxu0  ;;  %v6296_v36 = vmul.f32 0.17677669, %v2051_v52  ;;  %v2247_v45 = vsel %vm2225_vm4, %v6312_v1, -inf }
 0x3c8   : > { %v1666_v14 = vpop.f32.mrb[18].mxu1 }
 0x3c9   : > { %v6300_v44 = vmul.f32 0.17677669, %v1666_v14  ;;  %v4886_v31 = vpop.f32.mrb[19].mxu1  ;;  %v2265_v55 = vsel %vm2225_vm4, %v6296_v36, -inf }
 0x3ca   : > { %v2205_v29 = vpop.f32.mrb[20].mxu0  ;;  %2242 = vmax.xlane.f32.xlu1 %v2241_v20 }
 0x3cb   : > { %v4921_v50 = vpop.f32.mrb[21].mxu0  ;;  %v2250_v2 = vsel %vm2225_vm4, %v6300_v44, -inf  ;;  %v6304_v34 = vmul.f32 0.17677669, %v2205_v29 }
 0x3cc   : > { %2251 = vmax.xlane.f32.xlu0 %v2250_v2  ;;  %v1820_v26 = vpop.f32.mrb[20].mxu1 }
 0x3cd   : > { %v6308_v0 = vmul.f32 0.17677669, %v1820_v26  ;;  %v4896_v27 = vpop.f32.mrb[21].mxu1  ;;  %v2271_v30 = vsel %vm2225_vm4, %v6304_v34, -inf }
 0x3ce   : > { %2266 = vmax.xlane.f32.xlu1 %v2265_v55 }
 0x3cf   : > { %v2256_v38 = vsel %vm2225_vm4, %v6308_v0, -inf }
 0x3d0   : > { %2257 = vmax.xlane.f32.xlu0 %v2256_v38  ;;  %v1974_v22 = vpop.f32.mrb[22].mxu1 }
 0x3d1   : > { %v6316_v39 = vmul.f32 0.17677669, %v1974_v22  ;;  %v4906_v40 = vpop.f32.mrb[23].mxu1 }
 0x3d2   : > { %2272 = vmax.xlane.f32.xlu1 %v2271_v30 }
 0x3d3   : > { %v2262_v18 = vsel %vm2225_vm4, %v6316_v39, -inf }
 0x3d4   : > { %2263 = vmax.xlane.f32.xlu0 %v2262_v18  ;;  %v2128_v56 = vpop.f32.mrb[24].mxu1 }
 0x3d5   : > { %v6322_v41 = vmul.f32 0.17677669, %v2128_v56  ;;  %v4916_v43 = vpop.f32.mrb[25].mxu1 }
 0x3d6   : > { %2248 = vmax.xlane.f32.xlu1 %v2247_v45 }
 0x3d7   : > { %v2268_v49 = vsel %vm2225_vm4, %v6322_v41, -inf }
 0x3d8   : > { %2269 = vmax.xlane.f32.xlu0 %v2268_v49 }
 0x3e7   : > { %3238 = vrot.lane.b32.xlu1 %v6132_v6, %s5476_s21  ;;  %v6346_v6 = vpop.permute.xlu1 %3086 }
 0x3ee   : > { %3162 = vrot.lane.b32.xlu0 %v6134_v9, %s5476_s21 }
 0x3f2   : > { %3314 = vrot.lane.b32.xlu0 %v6142_v13, %s5476_s21 }
 0x437   : > { %v2228_v9 = vpop.xlane.xlu0 %2227 }
 0x438   : > { %v2274_v58 = vsub.f32 %v6262_v10, %v2228_v9 }
 0x43a   : > { %v2290_v13 = vmul.f32 1.442695, %v2274_v58 }
 0x43b   : > { %v2231_v16 = vpop.xlane.xlu1 %2230 }
 0x43c   : > { %5228 = vpow2.f32 %v2290_v13  ;;  %v2275_v35 = vsub.f32 %v6266_v61, %v2231_v16 }
 0x43e   : > { %v2292_v47 = vmul.f32 1.442695, %v2275_v35 }
 0x43f   : > { %v2234_v59 = vpop.xlane.xlu0 %2233 }
 0x440   : > { %5230 = vpow2.f32 %v2292_v47  ;;  %v2276_v48 = vsub.f32 %v6270_v51, %v2234_v59 }
 0x442   : > { %v2294_v60 = vmul.f32 1.442695, %v2276_v48 }
 0x443   : > { %v2237_v21 = vpop.xlane.xlu0 %2236 }
 0x444   : > { %5232 = vpow2.f32 %v2294_v60  ;;  %v2277_v63 = vsub.f32 %v6274_v3, %v2237_v21 }
 0x446   : > { %v6352_v7 = vpop.eup %5228  ;;  %v2296_v19 = vmul.f32 1.442695, %v2277_v63 }
 0x447   : > { %v2240_v15 = vpop.xlane.xlu0 %2239  ;;  %v2322_v10 = vsel %vm2225_vm4, %v6352_v7, 0.0 }
 0x448   : > { %5234 = vpow2.f32 %v2296_v19  ;;  %v2278_v61 = vsub.f32 %v6278_v57, %v2240_v15  ;;  %2323 = vadd.xlane.f32.xlu0 %v2322_v10 }
 0x44a   : > { %v6357_v62 = vpop.eup %5230  ;;  %v2298_v42 = vmul.f32 1.442695, %v2278_v61 }
 0x44b   : > { %v2325_v51 = vsel %vm2225_vm4, %v6357_v62, 0.0 }
 0x44c   : > { %5236 = vpow2.f32 %v2298_v42  ;;  %2326 = vadd.xlane.f32.xlu1 %v2325_v51 }
 0x44e   : > { %v6361_v3 = vpop.eup %5232 }
 0x44f   : > { %v2255_v52 = vpop.xlane.xlu1 %2254  ;;  %v2246_v4 = vpop.xlane.xlu0 %2245  ;;  %v2328_v14 = vsel %vm2225_vm4, %v6361_v3, 0.0 }
 0x450   : > { %v2283_v20 = vsub.f32 %v6282_v25, %v2255_v52  ;;  %v2280_v57 = vsub.f32 %v6284_v54, %v2246_v4  ;;  %2329 = vadd.xlane.f32.xlu0 %v2328_v14 }
 0x452   : > { %v6367_v31 = vpop.eup %5234  ;;  %v2308_v29 = vmul.f32 1.442695, %v2283_v20  ;;  %v2302_v50 = vmul.f32 1.442695, %v2280_v57 }
 0x453   : > { %v2261_v2 = vpop.xlane.xlu1 %2260  ;;  %v2331_v26 = vsel %vm2225_vm4, %v6367_v31, 0.0 }
 0x454   : > { %5238 = vpow2.f32 %v2308_v29  ;;  %v2285_v55 = vsub.f32 %v6290_v5, %v2261_v2  ;;  %2332 = vadd.xlane.f32.xlu1 %v2331_v26 }
 0x455   : > { %5240 = vpow2.f32 %v2302_v50 }
 0x456   : > { %v6372_v27 = vpop.eup %5236  ;;  %v2312_v38 = vmul.f32 1.442695, %v2285_v55 }
 0x457   : > { %v2243_v25 = vpop.xlane.xlu1 %2242  ;;  %v2334_v54 = vsel %vm2225_vm4, %v6372_v27, 0.0 }
 0x458   : > { %5242 = vpow2.f32 %v2312_v38  ;;  %v2279_v22 = vsub.f32 %v6292_v46, %v2243_v25  ;;  %2335 = vadd.xlane.f32.xlu0 %v2334_v54 }
 0x459   : > { %v2252_v30 = vpop.xlane.xlu0 %2251 }
 0x45a   : > { %v2300_v40 = vmul.f32 1.442695, %v2279_v22  ;;  %v2282_v49 = vsub.f32 %v6300_v44, %v2252_v30 }
 0x45b   : > { %v2267_v18 = vpop.xlane.xlu1 %2266 }
 0x45c   : > { %5244 = vpow2.f32 %v2300_v40  ;;  %v2287_v56 = vsub.f32 %v6296_v36, %v2267_v18  ;;  %v2306_v35 = vmul.f32 1.442695, %v2282_v49 }
 0x45d   : > { %v2258_v5 = vpop.xlane.xlu0 %2257 }
 0x45e   : > { %v6378_v45 = vpop.eup %5238  ;;  %v2316_v43 = vmul.f32 1.442695, %v2287_v56  ;;  %v2284_v44 = vsub.f32 %v6308_v0, %v2258_v5 }
 0x45f   : > { %v6381_v9 = vpop.eup %5240  ;;  %v2273_v58 = vpop.xlane.xlu1 %2272  ;;  %v2349_v13 = vsel %vm2225_vm4, %v6378_v45, 0.0 }
 0x460   : > { %5246 = vpow2.f32 %v2316_v43  ;;  %v2289_v46 = vsub.f32 %v6304_v34, %v2273_v58  ;;  %2350 = vadd.xlane.f32.xlu1 %v2349_v13  ;;  %v2340_v16 = vsel %vm2225_vm4, %v6381_v9, 0.0  ;;  %v2310_v63 = vmul.f32 1.442695, %v2284_v44 }
 0x461   : > { %2341 = vadd.xlane.f32.xlu0 %v2340_v16  ;;  %v2264_v48 = vpop.xlane.xlu0 %2263 }
 0x462   : > { %v6388_v36 = vpop.eup %5242  ;;  %v2320_v47 = vmul.f32 1.442695, %v2289_v46  ;;  %v2286_v15 = vsub.f32 %v6316_v39, %v2264_v48 }
 0x463   : > { %v2249_v59 = vpop.xlane.xlu1 %2248  ;;  %v2355_v60 = vsel %vm2225_vm4, %v6388_v36, 0.0 }
 0x464   : > { %5248 = vpow2.f32 %v2320_v47  ;;  %v2281_v21 = vsub.f32 %v6312_v1, %v2249_v59  ;;  %2356 = vadd.xlane.f32.xlu1 %v2355_v60  ;;  %v2314_v61 = vmul.f32 1.442695, %v2286_v15 }
 0x465   : > { %5250 = vpow2.f32 %v2306_v35  ;;  %v2270_v2 = vpop.xlane.xlu0 %2269 }
 0x466   : > { %v6394_v34 = vpop.eup %5244  ;;  %v2304_v19 = vmul.f32 1.442695, %v2281_v21  ;;  %v2288_v26 = vsub.f32 %v6322_v41, %v2270_v2 }
 0x467   : > { %v2337_v10 = vsel %vm2225_vm4, %v6394_v34, 0.0  ;;  %v6438_v22 = vpop.permute.xlu1 %3238 }
 0x468   : > { %5252 = vpow2.f32 %v2304_v19  ;;  %2338 = vadd.xlane.f32.xlu1 %v2337_v10  ;;  %v2318_v55 = vmul.f32 1.442695, %v2288_v26  ;;  %v5357_v26 = vld [vmem:[%s5645_s23 + $0x8] sm:$0xff] }
 0x469   : > { %5254 = vpow2.f32 %v2310_v63  ;;  %v6434_v54 = vpop.permute.xlu0 %3162 }
 0x46a   : > { %v6399_v0 = vpop.eup %5246  ;;  %5256 = vpow2.f32 %v2314_v61 }
 0x46b   : > { %v2361_v1 = vsel %vm2225_vm4, %v6399_v0, 0.0  ;;  %5258 = vpow2.f32 %v2318_v55 }
 0x46c   : > { %2362 = vadd.xlane.f32.xlu1 %v2361_v1 }
 0x46e   : > { %v6403_v42 = vpop.eup %5248 }
 0x46f   : > { %v2367_v51 = vsel %vm2225_vm4, %v6403_v42, 0.0  ;;  %v6407_v39 = vpop.eup %5250 }
 0x470   : > { %2368 = vadd.xlane.f32.xlu0 %v2367_v51  ;;  %v2346_v14 = vsel %vm2225_vm4, %v6407_v39, 0.0 }
 0x472   : > { %v6409_v52 = vpop.eup %5252 }
 0x473   : > { %v2343_v4 = vsel %vm2225_vm4, %v6409_v52, 0.0  ;;  %v6415_v20 = vpop.eup %5254 }
 0x474   : > { %2344 = vadd.xlane.f32.xlu1 %v2343_v4  ;;  %2347 = vadd.xlane.f32.xlu0 %v2346_v14  ;;  %v2352_v57 = vsel %vm2225_vm4, %v6415_v20, 0.0  ;;  %v6419_v29 = vpop.eup %5256 }
 0x475   : > { %v2358_v50 = vsel %vm2225_vm4, %v6419_v29, 0.0  ;;  %v6428_v38 = vpop.eup %5258 }
 0x476   : > { %v2364_v25 = vsel %vm2225_vm4, %v6428_v38, 0.0 }
 0x478   : > { %2353 = vadd.xlane.f32.xlu0 %v2352_v57 }
 0x47c   : > { %2359 = vadd.xlane.f32.xlu0 %v2358_v50 }
 0x485   : > { %3390 = vrot.lane.b32.xlu1 %v6140_v12, %s5476_s21  ;;  %v6436_v12 = vpop.permute.xlu0 %3314 }
 0x492   : > { %3466 = vrot.lane.b32.xlu0 %v6130_v28, %s5476_s21 }
 0x4a9   : > { %2365 = vadd.xlane.f32.xlu1 %v2364_v25 }
 0x4ba   : > { %3542 = vrot.lane.b32.xlu1 %v6128_v33, %s5476_s21  ;;  %s5406_s21 = sshll.u32 %s5477_s20, 4  ;;  %s5407_s21 = int_to_ptr.vmem [resolvable:$false] %s5406_s21 }
 0x4bb   : > { %p5409_p8 = scmp.lt.s32.totalorder %s6935_s29, %s5407_s21 }
 0x4d5   : > { %v2324_v28 = vpop.xlane.xlu0 %2323 }
 0x4d6   : > { %5260 = vrcp.f32 %v2324_v28 }
 0x4d9   : > { %v2327_v41 = vpop.xlane.xlu1 %2326 }
 0x4da   : > { %5262 = vrcp.f32 %v2327_v41 }
 0x4dd   : > { %v2330_v30 = vpop.xlane.xlu0 %2329 }
 0x4de   : > { %5264 = vrcp.f32 %v2330_v30 }
 0x4e0   : > { %v5261_v40 = vpop.eup %5260 }
 0x4e1   : > { %v2386_v18 = vmul.f32 %v5261_v40, %v6352_v7  ;;  %v2333_v56 = vpop.xlane.xlu1 %2332  ;;  %v5359_v40 = vld [vmem:[%s5645_s23 + $0x18] sm:$0xff] }
 0x4e2   : > { %5266 = vrcp.f32 %v2333_v56 }
 0x4e3   : > { %4925 = vmatmul.mubr.msk.f32.vlgmr.msra.gmra.mrb[26].mxu1 %vm2225_vm4, %v2386_v18 }
 0x4e4   : > { %v5263_v33 = vpop.eup %5262  ;;  %4933 = vmatpush3.msra.mxu1 %v6336_v23  ;;  %4934 = vmatprep.mubr.msk.f32.mxu1 %vm5474_vm3, %v5473_v8 }
 0x4e5   : > { %v2387_v5 = vmul.f32 %v5263_v33, %v6357_v62  ;;  %v2336_v43 = vpop.xlane.xlu0 %2335  ;;  %4942 = vmatprep.subr.mxu1 %v5473_v8 }
 0x4e6   : > { %5268 = vrcp.f32 %v2336_v43  ;;  %v5360_v43 = vld [vmem:[%s5645_s23 + $0x20] sm:$0xff] }
 0x4e7   : > { %4930 = vmatmul.mubr.msk.f32.vlgmr.msra.gmra.mrb[22].mxu0 %vm2225_vm4, %v2387_v5 }
 0x4e8   : > { %v5265_v49 = vpop.eup %5264  ;;  %4938 = vmatpush3.msra.mxu0 %v6332_v32  ;;  %4939 = vmatprep.mubr.msk.f32.mxu0 %vm5474_vm3, %v5473_v8 }
 0x4e9   : > { %v2388_v7 = vmul.f32 %v5265_v49, %v6361_v3  ;;  %4947 = vmatprep.subr.mxu0 %v5473_v8 }
 0x4eb   : > { %4935 = vmatmul.mubr.msk.f32.vlgmr.msra.gmra.mrb[28].mxu1 %vm2225_vm4, %v2388_v7 }
 0x4ec   : > { %v5267_v23 = vpop.eup %5266  ;;  %4943 = vmatpush3.msra.mxu1 %v6334_v11  ;;  %4944 = vmatprep.mubr.msk.f32.mxu1 %vm5474_vm3, %v5473_v8 }
 0x4ed   : > { %v2389_v62 = vmul.f32 %v5267_v23, %v6367_v31  ;;  %v2351_v58 = vpop.xlane.xlu1 %2350  ;;  %4952 = vmatprep.subr.mxu1 %v5473_v8 }
 0x4ee   : > { %v2342_v32 = vpop.xlane.xlu0 %2341 }
 0x4ef   : > { %5270 = vrcp.f32 %v2342_v32  ;;  %4940 = vmatmul.mubr.msk.f32.vlgmr.msra.gmra.mrb[24].mxu0 %vm2225_vm4, %v2389_v62 }
 0x4f0   : > { %v5269_v3 = vpop.eup %5268  ;;  %4948 = vmatpush3.msra.mxu0 %v6338_v24  ;;  %4949 = vmatprep.mubr.msk.f32.mxu0 %vm5474_vm3, %v5473_v8 }
 0x4f1   : > { %v2390_v11 = vmul.f32 %v5269_v3, %v6372_v27  ;;  %v2357_v13 = vpop.xlane.xlu1 %2356  ;;  %4957 = vmatprep.subr.mxu0 %v5473_v8 }
 0x4f3   : > { %4945 = vmatmul.mubr.msk.f32.vlgmr.msra.gmra.mrb[30].mxu1 %vm2225_vm4, %v2390_v11 }
 0x4f4   : > { %4953 = vmatpush3.msra.mxu1 %v6340_v37  ;;  %4954 = vmatprep.mubr.msk.f32.mxu1 %vm5474_vm3, %v5473_v8 }
 0x4f5   : > { %v2339_v31 = vpop.xlane.xlu1 %2338  ;;  %4962 = vmatprep.subr.mxu1 %v5473_v8 }
 0x4f6   : > { %5272 = vrcp.f32 %v2339_v31  ;;  %v5362_v31 = vld [vmem:[%s5645_s23 + $0x28] sm:$0xff] }
 0x4f9   : > { %v5271_v24 = vpop.eup %5270  ;;  %v2363_v27 = vpop.xlane.xlu1 %2362 }
 0x4fa   : > { %v2392_v46 = vmul.f32 %v5271_v24, %v6381_v9 }
 0x4fc   : > { %4955 = vmatmul.mubr.msk.f32.vlgmr.msra.gmra.mrb[32].mxu1 %vm2225_vm4, %v2392_v46 }
 0x4fd   : > { %v2369_v16 = vpop.xlane.xlu0 %2368  ;;  %4963 = vmatpush3.msra.mxu1 %v6344_v17  ;;  %4964 = vmatprep.mubr.msk.f32.mxu1 %vm5474_vm3, %v5473_v8 }
 0x4fe   : > { %4972 = vmatprep.subr.mxu1 %v5473_v8 }
 0x500   : > { %v5273_v37 = vpop.eup %5272 }
 0x501   : > { %v2391_v35 = vmul.f32 %v5273_v37, %v6394_v34  ;;  %v2345_v47 = vpop.xlane.xlu1 %2344  ;;  %v2348_v44 = vpop.xlane.xlu0 %2347  ;;  %v5363_v37 = vld [vmem:[%s5645_s23 + $0x38] sm:$0xff] }
 0x502   : > { %5274 = vrcp.f32 %v2345_v47 }
 0x503   : > { %5276 = vrcp.f32 %v2348_v44  ;;  %4950 = vmatmul.mubr.msk.f32.vlgmr.msra.gmra.mrb[26].mxu0 %vm2225_vm4, %v2391_v35 }
 0x504   : > { %5278 = vrcp.f32 %v2351_v58  ;;  %4958 = vmatpush3.msra.mxu0 %v6342_v53  ;;  %4959 = vmatprep.mubr.msk.f32.mxu0 %vm5474_vm3, %v5473_v8  ;;  %v5361_v58 = vld [vmem:[%s5645_s23 + $0x30] sm:$0xff] }
 0x505   : > { %v2354_v17 = vpop.xlane.xlu0 %2353  ;;  %4967 = vmatprep.subr.mxu0 %v5473_v8  ;;  %v3391_v1 = vpop.permute.xlu1 %3390 }
 0x506   : > { %5280 = vrcp.f32 %v2354_v17  ;;  %v5364_v17 = vld [vmem:[%s5645_s23 + $0x40] sm:$0xff] }
 0x507   : > { %5282 = vrcp.f32 %v2357_v13 }
 0x509   : > { %v2360_v9 = vpop.xlane.xlu0 %2359 }
 0x50a   : > { %5284 = vrcp.f32 %v2360_v9 }
 0x50b   : > { %5286 = vrcp.f32 %v2363_v27 }
 0x50c   : > { %v5275_v59 = vpop.eup %5274  ;;  %5288 = vrcp.f32 %v2369_v16 }
 0x50d   : > { %v5277_v48 = vpop.eup %5276  ;;  %v2393_v60 = vmul.f32 %v5275_v59, %v6409_v52  ;;  %v3467_v51 = vpop.permute.xlu0 %3466 }
 0x50e   : > { %v5279_v21 = vpop.eup %5278  ;;  %v2394_v34 = vmul.f32 %v5277_v48, %v6407_v39 }
 0x50f   : > { %4960 = vmatmul.mubr.msk.f32.vlgmr.msra.gmra.mrb[28].mxu0 %vm2225_vm4, %v2393_v60  ;;  %v2395_v63 = vmul.f32 %v5279_v21, %v6378_v45 }
 0x510   : > { %v5281_v53 = vpop.eup %5280  ;;  %4965 = vmatmul.mubr.msk.f32.vlgmr.msra.gmra.mrb[34].mxu1 %vm2225_vm4, %v2394_v34  ;;  %4968 = vmatpush3.msra.mxu0 %v6346_v6  ;;  %v5365_v34 = vld [vmem:[%s5645_s23 + $0x48] sm:$0xff] }
 0x511   : > { %v2396_v19 = vmul.f32 %v5281_v53, %v6415_v20  ;;  %4973 = vmatpush3.msra.mxu1 %v6434_v54  ;;  %4969 = vmatprep.mubr.msk.f32.mxu0 %vm5474_vm3, %v5473_v8  ;;  %v5283_v15 = vpop.eup %5282 }
 0x512   : > { %4974 = vmatprep.mubr.msk.f32.mxu1 %vm5474_vm3, %v5473_v8  ;;  %4977 = vmatprep.subr.mxu0 %v5473_v8  ;;  %v2397_v45 = vmul.f32 %v5283_v15, %v6388_v36  ;;  %v5366_v15 = vld [vmem:[%s5645_s23 + $0x50] sm:$0xff] }
 0x513   : > { %4982 = vmatprep.subr.mxu1 %v5473_v8  ;;  %4970 = vmatmul.mubr.msk.f32.vlgmr.msra.gmra.mrb[30].mxu0 %vm2225_vm4, %v2395_v63 }
 0x514   : > { %v5285_v6 = vpop.eup %5284  ;;  %4975 = vmatmul.mubr.msk.f32.vlgmr.msra.gmra.mrb[36].mxu1 %vm2225_vm4, %v2396_v19  ;;  %4978 = vmatpush3.msra.mxu0 %v6438_v22 }
 0x515   : > { %v2398_v10 = vmul.f32 %v5285_v6, %v6419_v29  ;;  %4983 = vmatpush3.msra.mxu1 %v6436_v12  ;;  %4979 = vmatprep.mubr.msk.f32.mxu0 %vm5474_vm3, %v5473_v8  ;;  %v5287_v61 = vpop.eup %5286  ;;  %v5356_v29 = vld [vmem:[%s5645_s23] sm:$0xff]  ;;  %v5358_v12 = vld [vmem:[%s5645_s23 + $0x10] sm:$0xff] }
 0x516   : > { %4984 = vmatprep.mubr.msk.f32.mxu1 %vm5474_vm3, %v5473_v8  ;;  %4987 = vmatprep.subr.mxu0 %v5473_v8  ;;  %v2399_v36 = vmul.f32 %v5287_v61, %v6399_v0  ;;  %v5289_v52 = vpop.eup %5288 }
 0x517   : > { %4992 = vmatprep.subr.mxu1 %v5473_v8  ;;  %4980 = vmatmul.mubr.msk.f32.vlgmr.msra.gmra.mrb[32].mxu0 %vm2225_vm4, %v2397_v45  ;;  %v2401_v0 = vmul.f32 %v5289_v52, %v6403_v42 }
 0x518   : > { %4985 = vmatmul.mubr.msk.f32.vlgmr.msra.gmra.mrb[38].mxu1 %vm2225_vm4, %v2398_v10  ;;  %4988 = vmatpush3.msra.mxu0 %v3391_v1 }
 0x519   : > { %4993 = vmatpush3.msra.mxu1 %v3467_v51  ;;  %4989 = vmatprep.mubr.msk.f32.mxu0 %vm5474_vm3, %v5473_v8  ;;  %v5367_v51 = vld [vmem:[%s5645_s23 + $0x58] sm:$0xff] }
 0x51a   : > { %4997 = vmatprep.subr.mxu0 %v5473_v8  ;;  %4994 = vmatprep.mubr.msk.f32.mxu1 %vm5474_vm3, %v5473_v8 }
 0x51b   : > { %4990 = vmatmul.mubr.msk.f32.vlgmr.msra.gmra.mrb[34].mxu0 %vm2225_vm4, %v2399_v36 }
 0x51c   : > { %4999 = vmatprep.mubr.msk.f32.mxu0 %vm5474_vm3, %v5473_v8 }
 0x536   : > { %v2366_v39 = vpop.xlane.xlu1 %2365 }
 0x537   : > { %5290 = vrcp.f32 %v2366_v39 }
 0x53a   : > { %v3543_v4 = vpop.permute.xlu1 %3542 }
 0x53b   : > { %4998 = vmatpush3.msra.mxu0 %v3543_v4 }
 0x53c   : > { %5000 = vmatmul.mubr.msk.f32.vlgmr.msra.gmra.mrb[36].mxu0 %vm2225_vm4, %v2401_v0  ;;  %v5368_v0 = vld [vmem:[%s5645_s23 + $0x60] sm:$0xff] }
 0x541   : > { %v5291_v14 = vpop.eup %5290 }
 0x542   : > { %v2400_v20 = vmul.f32 %v5291_v14, %v6428_v38 }
 0x544   : > { %4995 = vmatmul.mubr.msk.f32.vlgmr.msra.gmra.mrb[40].mxu1 %vm2225_vm4, %v2400_v20 }
 0x5b6   : > { %v2474_v57 = vpop.f32.mrb[26].mxu1 }
 0x5b7   : > { %v6524_v8 = vadd.f32 %v5356_v29, %v2474_v57  ;;  %v4926_v50 = vpop.f32.mrb[27].mxu1 }
 0x5b8   : > { %v5369_v50 = vld [vmem:[%s5645_s23 + $0x68] sm:$0xff] }
 0x5b9   : > { %v3636_v2 = vsel %vm398_vm0, %v6524_v8, 0.0 }
 0x5ba   : > { %v2550_v42 = vpop.f32.mrb[22].mxu0  ;;  %3637 = vadd.xlane.f32.xlu0 %v3636_v2 }
 0x5bb   : > { %v6529_v55 = vadd.f32 %v5357_v26, %v2550_v42  ;;  %v4931_v25 = vpop.f32.mrb[23].mxu0 }
 0x5bd   : > { %v3639_v38 = vsel %vm398_vm0, %v6529_v55, 0.0 }
 0x5be   : > { %3640 = vadd.xlane.f32.xlu1 %v3639_v38  ;;  %v2626_v54 = vpop.f32.mrb[28].mxu1  ;;  %v5370_v38 = vld [vmem:[%s5645_s23 + $0x78] sm:$0xff] }
 0x5bf   : > { %v6534_v22 = vadd.f32 %v5358_v12, %v2626_v54  ;;  %v4936_v28 = vpop.f32.mrb[29].mxu1 }
 0x5c1   : > { %v3642_v41 = vsel %vm398_vm0, %v6534_v22, 0.0 }
 0x5c2   : > { %v2702_v30 = vpop.f32.mrb[24].mxu0  ;;  %3643 = vadd.xlane.f32.xlu0 %v3642_v41 }
 0x5c3   : > { %v6539_v18 = vadd.f32 %v5359_v40, %v2702_v30  ;;  %v4941_v56 = vpop.f32.mrb[25].mxu0  ;;  %v5371_v30 = vld [vmem:[%s5645_s23 + $0x70] sm:$0xff]  ;;  %s5408_s23 = scalar_lea.vmem %s5407_s21, 4096 }
 0x5c4   : > { %p5410_p10 = scmp.lt.s32.totalorder %s5408_s23, %s5402_s12 }
 0x5c5   : > { %v3645_v33 = vsel %vm398_vm0, %v6539_v18, 0.0 }
 0x5c6   : > { %3646 = vadd.xlane.f32.xlu0 %v3645_v33  ;;  %v2778_v5 = vpop.f32.mrb[30].mxu1  ;;  %p5411_p0 = por %p5410_p10, %p5409_p8 }
 0x5c7   : > { %v6544_v49 = vadd.f32 %v5360_v43, %v2778_v5  ;;  %v4946_v7 = vpop.f32.mrb[31].mxu1 }
 0x5c8   : > { %p5412_p2 = pnand %p5411_p0, %p5405_p13 }
 0x5c9   : > { %v3648_v23 = vsel %vm398_vm0, %v6544_v49, 0.0 }
 0x5ca   : > { %3649 = vadd.xlane.f32.xlu0 %v3648_v23 }
 0x5cf   : > { %v2930_v62 = vpop.f32.mrb[32].mxu1 }
 0x5d0   : > { %v6549_v32 = vadd.f32 %v5361_v58, %v2930_v62  ;;  %v4956_v3 = vpop.f32.mrb[33].mxu1 }
 0x5d2   : > { %v3654_v11 = vsel %vm398_vm0, %v6549_v32, 0.0 }
 0x5d3   : > { %3655 = vadd.xlane.f32.xlu0 %v3654_v11 }
 0x5d6   : > { %v2854_v13 = vpop.f32.mrb[26].mxu0 }
 0x5d7   : > { %v6554_v24 = vadd.f32 %v5362_v31, %v2854_v13  ;;  %v4951_v46 = vpop.f32.mrb[27].mxu0 }
 0x5d9   : > { %v3651_v27 = vsel %vm398_vm0, %v6554_v24, 0.0 }
 0x5da   : > { %3652 = vadd.xlane.f32.xlu1 %v3651_v27 }
 0x5e2   : > { %v3006_v16 = vpop.f32.mrb[28].mxu0 }
 0x5e3   : > { %v6559_v35 = vadd.f32 %v5363_v37, %v3006_v16  ;;  %v3082_v47 = vpop.f32.mrb[34].mxu1  ;;  %v4961_v44 = vpop.f32.mrb[29].mxu0 }
 0x5e4   : > { %v6562_v9 = vadd.f32 %v5364_v17, %v3082_v47  ;;  %v4966_v59 = vpop.f32.mrb[35].mxu1 }
 0x5e5   : > { %v3657_v48 = vsel %vm398_vm0, %v6559_v35, 0.0 }
 0x5e6   : > { %v3158_v60 = vpop.f32.mrb[30].mxu0  ;;  %3658 = vadd.xlane.f32.xlu1 %v3657_v48  ;;  %v3660_v21 = vsel %vm398_vm0, %v6562_v9, 0.0 }
 0x5e7   : > { %v6569_v53 = vadd.f32 %v5365_v34, %v3158_v60  ;;  %3661 = vadd.xlane.f32.xlu0 %v3660_v21  ;;  %v3234_v63 = vpop.f32.mrb[36].mxu1  ;;  %v4971_v19 = vpop.f32.mrb[31].mxu0 }
 0x5e8   : > { %v6572_v6 = vadd.f32 %v5366_v15, %v3234_v63  ;;  %v4976_v45 = vpop.f32.mrb[37].mxu1 }
 0x5e9   : > { %v3663_v10 = vsel %vm398_vm0, %v6569_v53, 0.0 }
 0x5ea   : > { %v3310_v61 = vpop.f32.mrb[32].mxu0  ;;  %3664 = vadd.xlane.f32.xlu1 %v3663_v10  ;;  %v3666_v1 = vsel %vm398_vm0, %v6572_v6, 0.0 }
 0x5eb   : > { %v6579_v36 = vadd.f32 %v5367_v51, %v3310_v61  ;;  %3667 = vadd.xlane.f32.xlu0 %v3666_v1  ;;  %v3386_v39 = vpop.f32.mrb[38].mxu1  ;;  %v4981_v52 = vpop.f32.mrb[33].mxu0 }
 0x5ec   : > { %v6582_v4 = vadd.f32 %v5368_v0, %v3386_v39  ;;  %v4986_v14 = vpop.f32.mrb[39].mxu1 }
 0x5ed   : > { %v3669_v20 = vsel %vm398_vm0, %v6579_v36, 0.0 }
 0x5ee   : > { %v3462_v57 = vpop.f32.mrb[34].mxu0  ;;  %3670 = vadd.xlane.f32.xlu1 %v3669_v20  ;;  %v3672_v29 = vsel %vm398_vm0, %v6582_v4, 0.0 }
 0x5ef   : > { %v6589_v2 = vadd.f32 %v5369_v50, %v3462_v57  ;;  %3673 = vadd.xlane.f32.xlu0 %v3672_v29  ;;  %v4991_v42 = vpop.f32.mrb[35].mxu0 }
 0x5f1   : > { %v3675_v26 = vsel %vm398_vm0, %v6589_v2, 0.0 }
 0x5f2   : > { %3676 = vadd.xlane.f32.xlu1 %v3675_v26 }
 0x60f   : > { %v3614_v25 = vpop.f32.mrb[36].mxu0 }
 0x610   : > { %v6594_v54 = vadd.f32 %v5370_v38, %v3614_v25  ;;  %v5001_v12 = vpop.f32.mrb[37].mxu0 }
 0x612   : > { %v3681_v28 = vsel %vm398_vm0, %v6594_v54, 0.0 }
 0x613   : > { %3682 = vadd.xlane.f32.xlu1 %v3681_v28 }
 0x617   : > { %v3538_v41 = vpop.f32.mrb[40].mxu1 }
 0x618   : > { %v6599_v40 = vadd.f32 %v5371_v30, %v3538_v41  ;;  %v4996_v56 = vpop.f32.mrb[41].mxu1 }
 0x61a   : > { %v3678_v33 = vsel %vm398_vm0, %v6599_v40, 0.0 }
 0x61b   : > { %3679 = vadd.xlane.f32.xlu0 %v3678_v33 }
 0x647   : > { %v3638_v5 = vpop.xlane.xlu0 %3637 }
 0x648   : > { %v3684_v43 = vmul.f32 0.03125, %v3638_v5 }
 0x64a   : > { %v6604_v7 = vsub.f32 %v6524_v8, %v3684_v43 }
 0x64b   : > { %v3641_v23 = vpop.xlane.xlu1 %3640 }
 0x64c   : > { %v3685_v62 = vmul.f32 0.03125, %v3641_v23  ;;  %v3716_v58 = vmul.f32 %v6604_v7, %v6604_v7 }
 0x64e   : > { %v6609_v3 = vsub.f32 %v6529_v55, %v3685_v62  ;;  %v3732_v11 = vsel %vm398_vm0, %v3716_v58, 0.0 }
 0x64f   : > { %3733 = vadd.xlane.f32.xlu0 %v3732_v11  ;;  %v3644_v13 = vpop.xlane.xlu0 %3643 }
 0x650   : > { %v3686_v31 = vmul.f32 0.03125, %v3644_v13  ;;  %v3717_v46 = vmul.f32 %v6609_v3, %v6609_v3 }
 0x652   : > { %v6615_v27 = vsub.f32 %v6534_v22, %v3686_v31  ;;  %v3735_v16 = vsel %vm398_vm0, %v3717_v46, 0.0 }
 0x653   : > { %3736 = vadd.xlane.f32.xlu1 %v3735_v16  ;;  %v3647_v37 = vpop.xlane.xlu0 %3646 }
 0x654   : > { %v3687_v47 = vmul.f32 0.03125, %v3647_v37  ;;  %v3718_v44 = vmul.f32 %v6615_v27, %v6615_v27 }
 0x656   : > { %v6621_v17 = vsub.f32 %v6539_v18, %v3687_v47  ;;  %v3738_v59 = vsel %vm398_vm0, %v3718_v44, 0.0  ;;  %v4016_v47 = vld [vmem:[%s6986_s2] sm:$0xff]  ;;  %v4017_v44 = vld [vmem:[%s6986_s2 + $0x8] sm:$0xff] }
 0x657   : > { %3739 = vadd.xlane.f32.xlu0 %v3738_v59  ;;  %v3650_v48 = vpop.xlane.xlu0 %3649 }
 0x658   : > { %v3688_v60 = vmul.f32 0.03125, %v3650_v48  ;;  %v3719_v21 = vmul.f32 %v6621_v17, %v6621_v17 }
 0x65a   : > { %v6627_v34 = vsub.f32 %v6544_v49, %v3688_v60  ;;  %v3741_v63 = vsel %vm398_vm0, %v3719_v21, 0.0  ;;  %v5082_v21 = vpack.c.bf16 %v4017_v44, %v4016_v47  ;;  %v4240_v47 = vld [vmem:[%s6988_s4 + $0x20] sm:$0xff]  ;;  %v4241_v44 = vld [vmem:[%s6988_s4 + $0x28] sm:$0xff] }
 0x65b   : > { %3742 = vadd.xlane.f32.xlu1 %v3741_v63 }
 0x65c   : > { %v3720_v19 = vmul.f32 %v6627_v34, %v6627_v34  ;;  %5083 = vmatprep.subr.bf16.mxu1 %v5082_v21 }
 0x65d   : > { %5085 = vmatpush3.bf16.msra.mxu1 %v5082_v21 }
 0x65e   : > { %v3744_v15 = vsel %vm398_vm0, %v3720_v19, 0.0 }
 0x65f   : > { %3745 = vadd.xlane.f32.xlu0 %v3744_v15 }
 0x660   : > { %v3656_v45 = vpop.xlane.xlu0 %3655 }
 0x661   : > { %v3690_v10 = vmul.f32 0.03125, %v3656_v45 }
 0x663   : > { %v6634_v61 = vsub.f32 %v6549_v32, %v3690_v10 }
 0x665   : > { %v3722_v1 = vmul.f32 %v6634_v61, %v6634_v61 }
 0x667   : > { %v3653_v51 = vpop.xlane.xlu1 %3652  ;;  %v3750_v39 = vsel %vm398_vm0, %v3722_v1, 0.0  ;;  %v4018_v1 = vld [vmem:[%s6986_s2 + $0x10] sm:$0xff] }
 0x668   : > { %v3689_v52 = vmul.f32 0.03125, %v3653_v51  ;;  %3751 = vadd.xlane.f32.xlu0 %v3750_v39  ;;  %v4019_v51 = vld [vmem:[%s6986_s2 + $0x18] sm:$0xff] }
 0x66a   : > { %v6640_v0 = vsub.f32 %v6554_v24, %v3689_v52  ;;  %v5086_v52 = vpack.c.bf16 %v4019_v51, %v4018_v1 }
 0x66c   : > { %v3721_v14 = vmul.f32 %v6640_v0, %v6640_v0  ;;  %5087 = vmatprep.subr.bf16.mxu1 %v5086_v52 }
 0x66d   : > { %5089 = vmatpush3.bf16.msra.mxu1 %v5086_v52 }
 0x66e   : > { %v3747_v20 = vsel %vm398_vm0, %v3721_v14, 0.0 }
 0x66f   : > { %3748 = vadd.xlane.f32.xlu1 %v3747_v20 }
 0x673   : > { %v3659_v57 = vpop.xlane.xlu1 %3658 }
 0x674   : > { %v3691_v29 = vmul.f32 0.03125, %v3659_v57  ;;  %v3662_v50 = vpop.xlane.xlu0 %3661 }
 0x675   : > { %v3692_v42 = vmul.f32 0.03125, %v3662_v50 }
 0x676   : > { %v6646_v26 = vsub.f32 %v6559_v35, %v3691_v29 }
 0x677   : > { %v6649_v25 = vsub.f32 %v6562_v9, %v3692_v42  ;;  %v3665_v38 = vpop.xlane.xlu1 %3664 }
 0x678   : > { %v3693_v12 = vmul.f32 0.03125, %v3665_v38  ;;  %v3668_v28 = vpop.xlane.xlu0 %3667  ;;  %v3723_v41 = vmul.f32 %v6646_v26, %v6646_v26 }
 0x679   : > { %v3694_v30 = vmul.f32 0.03125, %v3668_v28  ;;  %v3724_v56 = vmul.f32 %v6649_v25, %v6649_v25 }
 0x67a   : > { %v6656_v33 = vsub.f32 %v6569_v53, %v3693_v12  ;;  %v3753_v5 = vsel %vm398_vm0, %v3723_v41, 0.0 }
 0x67b   : > { %v6660_v43 = vsub.f32 %v6572_v6, %v3694_v30  ;;  %v3671_v23 = vpop.xlane.xlu1 %3670  ;;  %3754 = vadd.xlane.f32.xlu1 %v3753_v5  ;;  %v3756_v62 = vsel %vm398_vm0, %v3724_v56, 0.0 }
 0x67c   : > { %v3695_v58 = vmul.f32 0.03125, %v3671_v23  ;;  %3757 = vadd.xlane.f32.xlu0 %v3756_v62  ;;  %v3674_v11 = vpop.xlane.xlu0 %3673  ;;  %v3725_v13 = vmul.f32 %v6656_v33, %v6656_v33 }
 0x67d   : > { %v3696_v31 = vmul.f32 0.03125, %v3674_v11  ;;  %v3726_v46 = vmul.f32 %v6660_v43, %v6660_v43  ;;  %v4236_v11 = vld [vmem:[%s6988_s4] sm:$0xff] }
 0x67e   : > { %v6668_v16 = vsub.f32 %v6579_v36, %v3695_v58  ;;  %v3759_v37 = vsel %vm398_vm0, %v3725_v13, 0.0  ;;  %v4237_v13 = vld [vmem:[%s6988_s4 + $0x8] sm:$0xff] }
 0x67f   : > { %v6678_v59 = vsub.f32 %v6582_v4, %v3696_v31  ;;  %v3677_v48 = vpop.xlane.xlu1 %3676  ;;  %3760 = vadd.xlane.f32.xlu1 %v3759_v37  ;;  %v3762_v60 = vsel %vm398_vm0, %v3726_v46, 0.0  ;;  %v4238_v31 = vld [vmem:[%s6988_s4 + $0x10] sm:$0xff]  ;;  %v5090_v46 = vpack.c.bf16 %v4237_v13, %v4236_v11  ;;  %v4239_v37 = vld [vmem:[%s6988_s4 + $0x18] sm:$0xff] }
 0x680   : > { %v3697_v63 = vmul.f32 0.03125, %v3677_v48  ;;  %3763 = vadd.xlane.f32.xlu0 %v3762_v60  ;;  %v3727_v19 = vmul.f32 %v6668_v16, %v6668_v16  ;;  %v5094_v60 = vpack.c.bf16 %v4239_v37, %v4238_v31 }
 0x681   : > { %v3728_v15 = vmul.f32 %v6678_v59, %v6678_v59  ;;  %5091 = vmatprep.subr.bf16.mxu0 %v5090_v46 }
 0x682   : > { %v6686_v45 = vsub.f32 %v6589_v2, %v3697_v63  ;;  %v3765_v10 = vsel %vm398_vm0, %v3727_v19, 0.0  ;;  %5093 = vmatpush3.bf16.msra.mxu0 %v5090_v46  ;;  %v5098_v63 = vpack.c.bf16 %v4241_v44, %v4240_v47  ;;  %v6732_v46 = vld [vmem:[%s6992_s8] ss:$0 sm:$0xff] }
 0x683   : > { %3766 = vadd.xlane.f32.xlu1 %v3765_v10  ;;  %v3768_v39 = vsel %vm398_vm0, %v3728_v15, 0.0  ;;  %5095 = vmatprep.subr.bf16.mxu0 %v5094_v60 }
 0x684   : > { %3769 = vadd.xlane.f32.xlu0 %v3768_v39  ;;  %v3729_v14 = vmul.f32 %v6686_v45, %v6686_v45 }
 0x686   : > { %v3771_v20 = vsel %vm398_vm0, %v3729_v14, 0.0  ;;  %5097 = vmatpush3.bf16.msra.mxu0 %v5094_v60 }
 0x687   : > { %3772 = vadd.xlane.f32.xlu1 %v3771_v20  ;;  %5099 = vmatprep.subr.bf16.mxu0 %v5098_v63 }
 0x68a   : > { %5101 = vmatpush3.bf16.msra.mxu0 %v5098_v63 }
 0x6a0   : > { %v3683_v57 = vpop.xlane.xlu1 %3682 }
 0x6a1   : > { %v3699_v29 = vmul.f32 0.03125, %v3683_v57 }
 0x6a3   : > { %v6700_v50 = vsub.f32 %v6594_v54, %v3699_v29 }
 0x6a5   : > { %v3731_v42 = vmul.f32 %v6700_v50, %v6700_v50 }
 0x6a7   : > { %v3777_v38 = vsel %vm398_vm0, %v3731_v42, 0.0 }
 0x6a8   : > { %3778 = vadd.xlane.f32.xlu1 %v3777_v38  ;;  %v3680_v12 = vpop.xlane.xlu0 %3679 }
 0x6a9   : > { %v3698_v28 = vmul.f32 0.03125, %v3680_v12 }
 0x6ab   : > { %v6706_v41 = vsub.f32 %v6599_v40, %v3698_v28 }
 0x6ad   : > { %v3730_v30 = vmul.f32 %v6706_v41, %v6706_v41 }
 0x6af   : > { %v3774_v56 = vsel %vm398_vm0, %v3730_v30, 0.0 }
 0x6b0   : > { %3775 = vadd.xlane.f32.xlu0 %v3774_v56 }
 0x6dc   : > { %v3734_v5 = vpop.xlane.xlu0 %3733 }
 0x6dd   : > { %v3780_v23 = vmul.f32 0.032258064, %v3734_v5 }
 0x6df   : > { %5292 = vrsqrt.f32 %v3780_v23  ;;  %vm3798_vm5 = vcmp.eq.f32.partialorder %v3780_v23, inf  ;;  %v3801_v51 = vand.u32 2147483648, %v3780_v23  ;;  %vm3800_vm6 = vcmp.eq.f32.partialorder %v3780_v23, 0.0 }
 0x6e0   : > { %v3737_v62 = vpop.xlane.xlu1 %3736 }
 0x6e1   : > { %v3781_v58 = vmul.f32 0.032258064, %v3737_v62 }
 0x6e3   : > { %5294 = vrsqrt.f32 %v3781_v58  ;;  %vm3805_vm7 = vcmp.eq.f32.partialorder %v3781_v58, inf  ;;  %v3808_v38 = vand.u32 2147483648, %v3781_v58  ;;  %vm3807_vm8 = vcmp.eq.f32.partialorder %v3781_v58, 0.0 }
 0x6e4   : > { %v3740_v48 = vpop.xlane.xlu0 %3739 }
 0x6e5   : > { %v3782_v21 = vmul.f32 0.032258064, %v3740_v48 }
 0x6e7   : > { %5296 = vrsqrt.f32 %v3782_v21  ;;  %vm3812_vm9 = vcmp.eq.f32.partialorder %v3782_v21, inf  ;;  %v3815_v62 = vand.u32 2147483648, %v3782_v21  ;;  %vm3814_vm10 = vcmp.eq.f32.partialorder %v3782_v21, 0.0 }
 0x6e8   : > { %v3743_v19 = vpop.xlane.xlu1 %3742 }
 0x6e9   : > { %v5293_v15 = vpop.eup %5292  ;;  %v3783_v10 = vmul.f32 0.032258064, %v3743_v19 }
 0x6ea   : > { %v3797_v1 = vmul.f32 %v5293_v15, %v3780_v23 }
 0x6eb   : > { %5298 = vrsqrt.f32 %v3783_v10  ;;  %vm3819_vm14 = vcmp.eq.f32.partialorder %v3783_v10, inf  ;;  %v3822_v44 = vand.u32 2147483648, %v3783_v10  ;;  %vm3821_vm11 = vcmp.eq.f32.partialorder %v3783_v10, 0.0 }
 0x6ec   : > { %v3799_v39 = vsel %vm3798_vm5, %v3780_v23, %v3797_v1  ;;  %v3746_v52 = vpop.xlane.xlu0 %3745  ;;  %v6739_v1 = vld [vmem:[%s6993_s9] ss:$0 sm:$0xff] }
 0x6ed   : > { %v5295_v14 = vpop.eup %5294  ;;  %v3802_v20 = vsel %vm3800_vm6, %v3801_v51, %v3799_v39  ;;  %v3784_v57 = vmul.f32 0.032258064, %v3746_v52 }
 0x6ee   : > { %v3804_v29 = vmul.f32 %v5295_v14, %v3781_v58  ;;  %v3908_v42 = vadd.f32 1e-06, %v3802_v20 }
 0x6ef   : > { %5300 = vrsqrt.f32 %v3784_v57  ;;  %vm3826_vm12 = vcmp.eq.f32.partialorder %v3784_v57, inf  ;;  %v3829_v39 = vand.u32 2147483648, %v3784_v57  ;;  %vm3828_vm13 = vcmp.eq.f32.partialorder %v3784_v57, 0.0 }
 0x6f0   : > { %v3806_v12 = vsel %vm3805_vm7, %v3781_v58, %v3804_v29  ;;  %5302 = vrcp.f32 %v3908_v42 }
 0x6f1   : > { %v5297_v28 = vpop.eup %5296  ;;  %v3809_v30 = vsel %vm3807_vm8, %v3808_v38, %v3806_v12  ;;  %v3963_v38 = vmul.f32 %v6732_v46, %v6609_v3  ;;  %v3965_v3 = vmul.f32 %v6732_v46, %v6621_v17 }
 0x6f2   : > { %v3909_v56 = vadd.f32 1e-06, %v3809_v30  ;;  %v3811_v5 = vmul.f32 %v5297_v28, %v3782_v21 }
 0x6f4   : > { %5304 = vrcp.f32 %v3909_v56  ;;  %v3813_v23 = vsel %vm3812_vm9, %v3782_v21, %v3811_v5  ;;  %v3962_v21 = vmul.f32 %v6732_v46, %v6604_v7 }
 0x6f5   : > { %v5299_v11 = vpop.eup %5298  ;;  %v3816_v13 = vsel %vm3814_vm10, %v3815_v62, %v3813_v23  ;;  %v3752_v31 = vpop.xlane.xlu0 %3751 }
 0x6f6   : > { %v3818_v37 = vmul.f32 %v5299_v11, %v3783_v10  ;;  %v3786_v58 = vmul.f32 0.032258064, %v3752_v31  ;;  %v3910_v47 = vadd.f32 1e-06, %v3816_v13 }
 0x6f8   : > { %v3820_v48 = vsel %vm3819_vm14, %v3783_v10, %v3818_v37  ;;  %5306 = vrsqrt.f32 %v3786_v58  ;;  %vm3840_vm15 = vcmp.eq.f32.partialorder %v3786_v58, inf  ;;  %v3843_v13 = vand.u32 2147483648, %v3786_v58 }
 0x6f9   : > { %v5301_v60 = vpop.eup %5300  ;;  %v3823_v63 = vsel %vm3821_vm11, %v3822_v44, %v3820_v48  ;;  %5308 = vrcp.f32 %v3910_v47  ;;  %vm3842_vm1 = vcmp.eq.f32.partialorder %v3786_v58, 0.0 }
 0x6fa   : > { %v5303_v19 = vpop.eup %5302  ;;  %v3825_v15 = vmul.f32 %v5301_v60, %v3784_v57  ;;  %v3911_v51 = vadd.f32 1e-06, %v3823_v63 }
 0x6fb   : > { %v3978_v52 = vmul.f32 %v5303_v19, %v3962_v21 }
 0x6fc   : > { %v3827_v14 = vsel %vm3826_vm12, %v3784_v57, %v3825_v15  ;;  %v3749_v10 = vpop.xlane.xlu1 %3748  ;;  %5310 = vrcp.f32 %v3911_v51  ;;  %v3964_v57 = vmul.f32 %v6732_v46, %v6615_v27 }
 0x6fd   : > { %v3830_v20 = vsel %vm3828_vm13, %v3829_v39, %v3827_v14  ;;  %v3785_v29 = vmul.f32 0.032258064, %v3749_v10  ;;  %v4000_v7 = vadd.f32 %v6739_v1, %v3978_v52  ;;  %v3966_v39 = vmul.f32 %v6732_v46, %v6627_v34 }
 0x6fe   : > { %v5305_v42 = vpop.eup %5304  ;;  %v3912_v12 = vadd.f32 1e-06, %v3830_v20 }
 0x6ff   : > { %5312 = vrsqrt.f32 %v3785_v29  ;;  %5010 = vmatprep.mubr.msk.f32.mxu1 %vm398_vm0, %v4000_v7  ;;  %v3979_v28 = vmul.f32 %v5305_v42, %v3963_v38  ;;  %vm3833_vm2 = vcmp.eq.f32.partialorder %v3785_v29, inf  ;;  %vm3835_vm3 = vcmp.eq.f32.partialorder %v3785_v29, 0.0 }
 0x700   : > { %5314 = vrcp.f32 %v3912_v12 }
 0x701   : > { %v4001_v56 = vadd.f32 %v6739_v1, %v3979_v28 }
 0x702   : > { %v5307_v30 = vpop.eup %5306 }
 0x703   : > { %v5309_v5 = vpop.eup %5308  ;;  %v3839_v62 = vmul.f32 %v5307_v30, %v3786_v58  ;;  %5011 = vmatmul.mubr.msk.f32.vlgmr.msra.gmra.mrb[42].mxu1 %vm398_vm0, %v4001_v56 }
 0x704   : > { %v3980_v23 = vmul.f32 %v5309_v5, %v3964_v57 }
 0x705   : > { %v3841_v11 = vsel %vm3840_vm15, %v3786_v58, %v3839_v62  ;;  %v3836_v58 = vand.u32 2147483648, %v3785_v29  ;;  %v3968_v62 = vmul.f32 %v6732_v46, %v6634_v61 }
 0x706   : > { %v5311_v31 = vpop.eup %5310  ;;  %v4002_v37 = vadd.f32 %v6739_v1, %v3980_v23  ;;  %v3844_v47 = vsel %vm3842_vm1, %v3843_v13, %v3841_v11  ;;  %v3967_v23 = vmul.f32 %v6732_v46, %v6640_v0 }
 0x707   : > { %v3981_v44 = vmul.f32 %v5311_v31, %v3965_v3  ;;  %v3914_v17 = vadd.f32 1e-06, %v3844_v47 }
 0x708   : > { %v3755_v27 = vpop.xlane.xlu1 %3754  ;;  %5013 = vmatprep.mubr.msk.f32.mxu1 %vm398_vm0, %v4002_v37 }
 0x709   : > { %v5313_v48 = vpop.eup %5312  ;;  %v3787_v60 = vmul.f32 0.032258064, %v3755_v27  ;;  %v3758_v21 = vpop.xlane.xlu0 %3757  ;;  %v4003_v63 = vadd.f32 %v6739_v1, %v3981_v44 }
 0x70a   : > { %v5315_v19 = vpop.eup %5314  ;;  %v3832_v15 = vmul.f32 %v5313_v48, %v3785_v29  ;;  %v3788_v51 = vmul.f32 0.032258064, %v3758_v21 }
 0x70b   : > { %5316 = vrsqrt.f32 %v3787_v60  ;;  %5014 = vmatmul.mubr.msk.f32.gmra.mrb[44].mxu1 %vm398_vm0, %v4003_v63  ;;  %v3982_v42 = vmul.f32 %v5315_v19, %v3966_v39  ;;  %vm3847_vm4 = vcmp.eq.f32.partialorder %v3787_v60, inf  ;;  %vm3849_vm5 = vcmp.eq.f32.partialorder %v3787_v60, 0.0 }
 0x70c   : > { %v3834_v52 = vsel %vm3833_vm2, %v3785_v29, %v3832_v15  ;;  %5318 = vrsqrt.f32 %v3788_v51  ;;  %v3761_v14 = vpop.xlane.xlu1 %3760  ;;  %v3850_v31 = vand.u32 2147483648, %v3787_v60  ;;  %vm3854_vm6 = vcmp.eq.f32.partialorder %v3788_v51, inf }
 0x70d   : > { %v3837_v10 = vsel %vm3835_vm3, %v3836_v58, %v3834_v52  ;;  %v3789_v20 = vmul.f32 0.032258064, %v3761_v14  ;;  %v3764_v7 = vpop.xlane.xlu0 %3763  ;;  %5320 = vrcp.f32 %v3914_v17  ;;  %v4004_v57 = vadd.f32 %v6739_v1, %v3982_v42 }
 0x70e   : > { %v3790_v38 = vmul.f32 0.032258064, %v3764_v7  ;;  %v3913_v12 = vadd.f32 1e-06, %v3837_v10  ;;  %vm3856_vm7 = vcmp.eq.f32.partialorder %v3788_v51, 0.0  ;;  %v3857_v27 = vand.u32 2147483648, %v3788_v51 }
 0x70f   : > { %5322 = vrsqrt.f32 %v3789_v20  ;;  %5016 = vmatprep.mubr.msk.f32.mxu1 %vm398_vm0, %v4004_v57  ;;  %vm3861_vm8 = vcmp.eq.f32.partialorder %v3789_v20, inf  ;;  %vm3863_vm9 = vcmp.eq.f32.partialorder %v3789_v20, 0.0  ;;  %v3864_v21 = vand.u32 2147483648, %v3789_v20 }
 0x710   : > { %5324 = vrsqrt.f32 %v3790_v38  ;;  %v3767_v28 = vpop.xlane.xlu1 %3766  ;;  %vm3868_vm10 = vcmp.eq.f32.partialorder %v3790_v38, inf  ;;  %vm3870_vm14 = vcmp.eq.f32.partialorder %v3790_v38, 0.0  ;;  %v3871_v52 = vand.u32 2147483648, %v3790_v38 }
 0x711   : > { %v6757_v34 = vmul.f32 0.032258064, %v3767_v28  ;;  %v3770_v30 = vpop.xlane.xlu0 %3769  ;;  %5326 = vrcp.f32 %v3913_v12 }
 0x712   : > { %v6760_v56 = vmul.f32 0.032258064, %v3770_v30 }
 0x713   : > { %5328 = vrsqrt.f32 %v6757_v34  ;;  %vm3875_vm11 = vcmp.eq.f32.partialorder %v6757_v34, inf  ;;  %vm3877_vm12 = vcmp.eq.f32.partialorder %v6757_v34, 0.0 }
 0x714   : > { %5330 = vrsqrt.f32 %v6760_v56  ;;  %v3773_v29 = vpop.xlane.xlu1 %3772  ;;  %vm3882_vm13 = vcmp.eq.f32.partialorder %v6760_v56, inf  ;;  %vm3884_vm15 = vcmp.eq.f32.partialorder %v6760_v56, 0.0 }
 0x715   : > { %v5317_v5 = vpop.eup %5316  ;;  %v6769_v3 = vmul.f32 0.032258064, %v3773_v29 }
 0x716   : > { %v5319_v11 = vpop.eup %5318  ;;  %v3846_v13 = vmul.f32 %v5317_v5, %v3787_v60 }
 0x717   : > { %v3853_v37 = vmul.f32 %v5319_v11, %v3788_v51  ;;  %5332 = vrsqrt.f32 %v6769_v3  ;;  %v5321_v47 = vpop.eup %5320  ;;  %vm3889_vm1 = vcmp.eq.f32.partialorder %v6769_v3, inf  ;;  %vm3891_vm2 = vcmp.eq.f32.partialorder %v6769_v3, 0.0 }
 0x718   : > { %v3848_v44 = vsel %vm3847_vm4, %v3787_v60, %v3846_v13  ;;  %v3984_v14 = vmul.f32 %v5321_v47, %v3968_v62  ;;  %v3878_v62 = vand.u32 2147483648, %v6757_v34 }
 0x719   : > { %v5323_v61 = vpop.eup %5322  ;;  %v3851_v48 = vsel %vm3849_vm5, %v3850_v31, %v3848_v44  ;;  %v3855_v0 = vsel %vm3854_vm6, %v3788_v51, %v3853_v37 }
 0x71a   : > { %v5325_v63 = vpop.eup %5324  ;;  %v3858_v19 = vsel %vm3856_vm7, %v3857_v27, %v3855_v0  ;;  %v3860_v15 = vmul.f32 %v5323_v61, %v3789_v20  ;;  %v3915_v17 = vadd.f32 1e-06, %v3851_v48  ;;  %v3892_v48 = vand.u32 2147483648, %v6769_v3 }
 0x71b   : > { %v5327_v39 = vpop.eup %5326  ;;  %v3867_v58 = vmul.f32 %v5325_v63, %v3790_v38  ;;  %v3916_v10 = vadd.f32 1e-06, %v3858_v19  ;;  %v3970_v19 = vmul.f32 %v6732_v46, %v6649_v25  ;;  %vm4251_vm7 = vcmask 523264  }
 0x71c   : > { %v3862_v60 = vsel %vm3861_vm8, %v3789_v20, %v3860_v15  ;;  %v3983_v7 = vmul.f32 %v5327_v39, %v3967_v23  ;;  %5334 = vrcp.f32 %v3915_v17  ;;  %v4006_v20 = vadd.f32 %v6739_v1, %v3984_v14 }
 0x71d   : > { %v5329_v42 = vpop.eup %5328  ;;  %v3865_v51 = vsel %vm3863_vm9, %v3864_v21, %v3862_v60  ;;  %v3869_v12 = vsel %vm3868_vm10, %v3790_v38, %v3867_v58  ;;  %5336 = vrcp.f32 %v3916_v10  ;;  %v3885_v38 = vand.u32 2147483648, %v6760_v56 }
 0x71e   : > { %v5331_v28 = vpop.eup %5330  ;;  %v3872_v30 = vsel %vm3870_vm14, %v3871_v52, %v3869_v12  ;;  %v3874_v57 = vmul.f32 %v5329_v42, %v6757_v34  ;;  %v4005_v29 = vadd.f32 %v6739_v1, %v3983_v7  ;;  %v3917_v5 = vadd.f32 1e-06, %v3865_v51 }
 0x71f   : > { %v3881_v23 = vmul.f32 %v5331_v28, %v6760_v56  ;;  %v3918_v11 = vadd.f32 1e-06, %v3872_v30  ;;  %v3971_v52 = vmul.f32 %v6732_v46, %v6656_v33  ;;  %v3973_v42 = vmul.f32 %v6732_v46, %v6668_v16 }
 0x720   : > { %v3876_v13 = vsel %vm3875_vm11, %v6757_v34, %v3874_v57  ;;  %5017 = vmatmul.mubr.msk.f32.gmra.mrb[46].mxu1 %vm398_vm0, %v4005_v29  ;;  %5338 = vrcp.f32 %v3917_v5  ;;  %v3969_v34 = vmul.f32 %v6732_v46, %v6646_v26  ;;  %v3972_v26 = vmul.f32 %v6732_v46, %v6660_v43 }
 0x721   : > { %v5333_v31 = vpop.eup %5332  ;;  %v3879_v37 = vsel %vm3877_vm12, %v3878_v62, %v3876_v13  ;;  %v3883_v47 = vsel %vm3882_vm13, %v6760_v56, %v3881_v23  ;;  %5019 = vmatprep.mubr.msk.f32.mxu1 %vm398_vm0, %v4006_v20  ;;  %5340 = vrcp.f32 %v3918_v11  ;;  %v3974_v12 = vmul.f32 %v6732_v46, %v6678_v59 }
 0x722   : > { %v3886_v44 = vsel %vm3884_vm15, %v3885_v38, %v3883_v47  ;;  %v3888_v27 = vmul.f32 %v5333_v31, %v6769_v3  ;;  %v3919_v61 = vadd.f32 1e-06, %v3879_v37  ;;  %v3975_v29 = vmul.f32 %v6732_v46, %v6686_v45 }
 0x723   : > { %v3920_v0 = vadd.f32 1e-06, %v3886_v44 }
 0x724   : > { %v3890_v21 = vsel %vm3889_vm1, %v6769_v3, %v3888_v27  ;;  %5342 = vrcp.f32 %v3919_v61 }
 0x725   : > { %v3893_v56 = vsel %vm3891_vm2, %v3892_v48, %v3890_v21  ;;  %5344 = vrcp.f32 %v3920_v0 }
 0x726   : > { %v5335_v63 = vpop.eup %5334  ;;  %v3921_v15 = vadd.f32 1e-06, %v3893_v56 }
 0x727   : > { %v5337_v17 = vpop.eup %5336  ;;  %v3985_v39 = vmul.f32 %v5335_v63, %v3969_v34 }
 0x728   : > { %v3986_v58 = vmul.f32 %v5337_v17, %v3970_v19  ;;  %5346 = vrcp.f32 %v3921_v15  ;;  %v3977_v19 = vmul.f32 %v6732_v46, %v6700_v50  ;;  %v3976_v15 = vmul.f32 %v6732_v46, %v6706_v41  ;;  %v4641_v41 = vld [vmem:[%s6987_s3] ss:$0 sm:$0xff] }
 0x729   : > { %v4007_v3 = vadd.f32 %v6739_v1, %v3985_v39 }
 0x72a   : > { %v5339_v14 = vpop.eup %5338  ;;  %v4008_v10 = vadd.f32 %v6739_v1, %v3986_v58  ;;  %v4242_v58 = vld [vmem:[%s6988_s4 + $0x30] sm:$0xff] }
 0x72b   : > { %v5341_v60 = vpop.eup %5340  ;;  %5020 = vmatmul.mubr.msk.f32.gmra.mrb[48].mxu1 %vm398_vm0, %v4007_v3  ;;  %v3987_v25 = vmul.f32 %v5339_v14, %v3971_v52  ;;  %v4243_v52 = vld [vmem:[%s6988_s4 + $0x38] sm:$0xff] }
 0x72c   : > { %5022 = vmatprep.mubr.msk.f32.mxu1 %vm398_vm0, %v4008_v10  ;;  %v3988_v7 = vmul.f32 %v5341_v60, %v3972_v26  ;;  %v5102_v14 = vpack.c.bf16 %v4243_v52, %v4242_v58 }
 0x72d   : > { %v4009_v33 = vadd.f32 %v6739_v1, %v3987_v25 }
 0x72e   : > { %v5343_v51 = vpop.eup %5342  ;;  %v4010_v43 = vadd.f32 %v6739_v1, %v3988_v7  ;;  %5103 = vmatprep.subr.bf16.mxu0 %v5102_v14 }
 0x72f   : > { %v5345_v28 = vpop.eup %5344  ;;  %5023 = vmatmul.mubr.msk.f32.gmra.mrb[50].mxu1 %vm398_vm0, %v4009_v33  ;;  %v3989_v30 = vmul.f32 %v5343_v51, %v3973_v42  ;;  %5105 = vmatpush3.bf16.msra.mxu0 %v5102_v14 }
 0x730   : > { %5025 = vmatprep.mubr.msk.f32.mxu1 %vm398_vm0, %v4010_v43  ;;  %v3990_v57 = vmul.f32 %v5345_v28, %v3974_v12 }
 0x731   : > { %v4011_v16 = vadd.f32 %v6739_v1, %v3989_v30 }
 0x732   : > { %v5347_v5 = vpop.eup %5346  ;;  %v4012_v62 = vadd.f32 %v6739_v1, %v3990_v57 }
 0x733   : > { %5026 = vmatmul.mubr.msk.f32.gmra.mrb[52].mxu1 %vm398_vm0, %v4011_v16  ;;  %v3991_v59 = vmul.f32 %v5347_v5, %v3975_v29 }
 0x734   : > { %5028 = vmatprep.mubr.msk.f32.mxu1 %vm398_vm0, %v4012_v62 }
 0x735   : > { %v3779_v23 = vpop.xlane.xlu1 %3778  ;;  %v4013_v20 = vadd.f32 %v6739_v1, %v3991_v59 }
 0x736   : > { %v3795_v11 = vmul.f32 0.032258064, %v3779_v23 }
 0x737   : > { %5029 = vmatmul.mubr.msk.f32.gmra.mrb[54].mxu1 %vm398_vm0, %v4013_v20 }
 0x738   : > { %5348 = vrsqrt.f32 %v3795_v11  ;;  %vm3903_vm3 = vcmp.eq.f32.partialorder %v3795_v11, inf  ;;  %v3906_v47 = vand.u32 2147483648, %v3795_v11  ;;  %vm3905_vm4 = vcmp.eq.f32.partialorder %v3795_v11, 0.0 }
 0x73d   : > { %v3776_v13 = vpop.xlane.xlu0 %3775 }
 0x73e   : > { %v3794_v38 = vmul.f32 0.032258064, %v3776_v13 }
 0x740   : > { %5350 = vrsqrt.f32 %v3794_v38  ;;  %vm3896_vm5 = vcmp.eq.f32.partialorder %v3794_v38, inf  ;;  %v3899_v0 = vand.u32 2147483648, %v3794_v38  ;;  %vm3898_vm6 = vcmp.eq.f32.partialorder %v3794_v38, 0.0 }
 0x742   : > { %v5349_v45 = vpop.eup %5348 }
 0x743   : > { %v3902_v31 = vmul.f32 %v5349_v45, %v3795_v11 }
 0x745   : > { %v3904_v37 = vsel %vm3903_vm3, %v3795_v11, %v3902_v31 }
 0x746   : > { %v3907_v44 = vsel %vm3905_vm4, %v3906_v47, %v3904_v37 }
 0x747   : > { %v3923_v61 = vadd.f32 1e-06, %v3907_v44 }
 0x749   : > { %5352 = vrcp.f32 %v3923_v61 }
 0x74a   : > { %v5351_v27 = vpop.eup %5350 }
 0x74b   : > { %v3895_v48 = vmul.f32 %v5351_v27, %v3794_v38 }
 0x74d   : > { %v3897_v21 = vsel %vm3896_vm5, %v3794_v38, %v3895_v48 }
 0x74e   : > { %v3900_v34 = vsel %vm3898_vm6, %v3899_v0, %v3897_v21 }
 0x74f   : > { %v3922_v56 = vadd.f32 1e-06, %v3900_v34 }
 0x751   : > { %5354 = vrcp.f32 %v3922_v56 }
 0x753   : > { %v5353_v63 = vpop.eup %5352 }
 0x754   : > { %v3993_v39 = vmul.f32 %v5353_v63, %v3977_v19 }
 0x756   : > { %v4015_v50 = vadd.f32 %v6739_v1, %v3993_v39 }
 0x75b   : > { %v5355_v17 = vpop.eup %5354 }
 0x75c   : > { %v3992_v3 = vmul.f32 %v5355_v17, %v3976_v15 }
 0x75e   : > { %v4014_v26 = vadd.f32 %v6739_v1, %v3992_v3 }
 0x760   : > { %5031 = vmatprep.mubr.msk.f32.mxu1 %vm398_vm0, %v4014_v26 }
 0x761   : > { %5032 = vmatmul.mubr.msk.f32.gmra.mrb[56].mxu1 %vm398_vm0, %v4015_v50 }
 0x7d6   : > { %v5012_v46 = vpop.f32.mrb[42].mxu1 }
 0x7d7   : > { %v4147_v10 = vadd.f32 %v5012_v46, %v4641_v41  ;;  %v4141_v60 = vpop.f32.mrb[43].mxu1 }
 0x7d8   : > { %v4142_v25 = vadd.f32 %v4641_v41, %v4141_v60 }
 0x7d9   : > { %v4221_v42 = vmax.f32 %v4147_v10, 0.0  ;;  %v6863_v10 = vld [vmem:[%s6989_s5] ss:$0 sm:$0xff] }
 0x7da   : > { %v4220_v7 = vmax.f32 %v4142_v25, 0.0 }
 0x7dc   : > { %5050 = vmatprep.mubr.msk.f32.mxu0 %vm4251_vm7, %v4220_v7 }
 0x7dd   : > { %5051 = vmatmul.mubr.msk.f32.vlgmr.msra.gmra.mrb[38].mxu0 %vm4251_vm7, %v4221_v42 }
 0x7de   : > { %v5015_v1 = vpop.f32.mrb[44].mxu1 }
 0x7df   : > { %v4157_v33 = vadd.f32 %v5015_v1, %v4641_v41  ;;  %v4151_v51 = vpop.f32.mrb[45].mxu1 }
 0x7e0   : > { %v4152_v12 = vadd.f32 %v4641_v41, %v4151_v51 }
 0x7e1   : > { %v4223_v28 = vmax.f32 %v4157_v33, 0.0 }
 0x7e2   : > { %v4222_v43 = vmax.f32 %v4152_v12, 0.0 }
 0x7e4   : > { %5053 = vmatprep.mubr.msk.f32.mxu0 %vm4251_vm7, %v4222_v43 }
 0x7e5   : > { %5054 = vmatmul.mubr.msk.f32.gmra.mrb[40].mxu0 %vm4251_vm7, %v4223_v28 }
 0x7f3   : > { %v5018_v30 = vpop.f32.mrb[46].mxu1 }
 0x7f4   : > { %v4167_v57 = vadd.f32 %v5018_v30, %v4641_v41  ;;  %v4161_v29 = vpop.f32.mrb[47].mxu1 }
 0x7f5   : > { %v4162_v16 = vadd.f32 %v4641_v41, %v4161_v29 }
 0x7f6   : > { %v4225_v62 = vmax.f32 %v4167_v57, 0.0 }
 0x7f7   : > { %v4224_v5 = vmax.f32 %v4162_v16, 0.0 }
 0x7f9   : > { %5056 = vmatprep.mubr.msk.f32.mxu0 %vm4251_vm7, %v4224_v5 }
 0x7fa   : > { %5057 = vmatmul.mubr.msk.f32.gmra.mrb[42].mxu0 %vm4251_vm7, %v4225_v62 }
 0x7fe   : > { %v5021_v59 = vpop.f32.mrb[48].mxu1 }
 0x7ff   : > { %v4177_v23 = vadd.f32 %v5021_v59, %v4641_v41  ;;  %v4171_v20 = vpop.f32.mrb[49].mxu1 }
 0x800   : > { %v4172_v11 = vadd.f32 %v4641_v41, %v4171_v20 }
 0x801   : > { %v4227_v45 = vmax.f32 %v4177_v23, 0.0 }
 0x802   : > { %v4226_v13 = vmax.f32 %v4172_v11, 0.0  ;;  %v5024_v38 = vpop.f32.mrb[50].mxu1 }
 0x803   : > { %v4187_v31 = vadd.f32 %v5024_v38, %v4641_v41  ;;  %v4181_v37 = vpop.f32.mrb[51].mxu1 }
 0x804   : > { %v4182_v47 = vadd.f32 %v4641_v41, %v4181_v37  ;;  %5059 = vmatprep.mubr.msk.f32.mxu0 %vm4251_vm7, %v4226_v13 }
 0x805   : > { %5060 = vmatmul.mubr.msk.f32.gmra.mrb[44].mxu0 %vm4251_vm7, %v4227_v45  ;;  %v4229_v61 = vmax.f32 %v4187_v31, 0.0 }
 0x806   : > { %v4228_v44 = vmax.f32 %v4182_v47, 0.0  ;;  %v5027_v27 = vpop.f32.mrb[52].mxu1 }
 0x807   : > { %v4197_v48 = vadd.f32 %v5027_v27, %v4641_v41  ;;  %v4191_v0 = vpop.f32.mrb[53].mxu1 }
 0x808   : > { %v4192_v21 = vadd.f32 %v4641_v41, %v4191_v0  ;;  %5062 = vmatprep.mubr.msk.f32.mxu0 %vm4251_vm7, %v4228_v44 }
 0x809   : > { %5063 = vmatmul.mubr.msk.f32.gmra.mrb[46].mxu0 %vm4251_vm7, %v4229_v61  ;;  %v4231_v63 = vmax.f32 %v4197_v48, 0.0 }
 0x80a   : > { %v4230_v34 = vmax.f32 %v4192_v21, 0.0  ;;  %v5030_v56 = vpop.f32.mrb[54].mxu1 }
 0x80b   : > { %v4207_v19 = vadd.f32 %v5030_v56, %v4641_v41  ;;  %v4201_v15 = vpop.f32.mrb[55].mxu1 }
 0x80c   : > { %v4202_v17 = vadd.f32 %v4641_v41, %v4201_v15  ;;  %5065 = vmatprep.mubr.msk.f32.mxu0 %vm4251_vm7, %v4230_v34 }
 0x80d   : > { %5066 = vmatmul.mubr.msk.f32.gmra.mrb[48].mxu0 %vm4251_vm7, %v4231_v63  ;;  %v4233_v58 = vmax.f32 %v4207_v19, 0.0 }
 0x80e   : > { %v4232_v39 = vmax.f32 %v4202_v17, 0.0 }
 0x810   : > { %5068 = vmatprep.mubr.msk.f32.mxu0 %vm4251_vm7, %v4232_v39 }
 0x811   : > { %5069 = vmatmul.mubr.msk.f32.gmra.mrb[50].mxu0 %vm4251_vm7, %v4233_v58 }
 0x834   : > { %v5033_v52 = vpop.f32.mrb[56].mxu1 }
 0x835   : > { %v4217_v3 = vadd.f32 %v5033_v52, %v4641_v41  ;;  %v4211_v14 = vpop.f32.mrb[57].mxu1 }
 0x836   : > { %v4212_v26 = vadd.f32 %v4641_v41, %v4211_v14 }
 0x837   : > { %v4235_v46 = vmax.f32 %v4217_v3, 0.0 }
 0x838   : > { %v4234_v50 = vmax.f32 %v4212_v26, 0.0 }
 0x83a   : > { %5071 = vmatprep.mubr.msk.f32.mxu0 %vm4251_vm7, %v4234_v50 }
 0x83b   : > { %5072 = vmatmul.mubr.msk.f32.gmra.mrb[52].mxu0 %vm4251_vm7, %v4235_v46 }
 0x8b0   : > { %v5052_v60 = vpop.f32.mrb[38].mxu0 }
 0x8b1   : > { %v4372_v25 = vadd.f32 %v5052_v60, %v6863_v10  ;;  %v4366_v7 = vpop.f32.mrb[39].mxu0 }
 0x8b2   : > { %v4367_v42 = vadd.f32 %v6863_v10, %v4366_v7 }
 0x8b3   : > { %v4446_v1 = vadd.f32 %v4372_v25, %v6529_v55 }
 0x8b4   : > { %v4445_v41 = vadd.f32 %v4367_v42, %v6524_v8 }
 0x8b5   : > { %4462 = vst.msk [vmem:[%s6871_s30 + $0x8] sm:$0xff] %vm398_vm0, %v4446_v1 }
 0x8b6   : > { %4461 = vst.msk [vmem:[%s6871_s30] sm:$0xff] %vm398_vm0, %v4445_v41 }
 0x8b8   : > { %v5055_v33 = vpop.f32.mrb[40].mxu0 }
 0x8b9   : > { %v4382_v51 = vadd.f32 %v5055_v33, %v6863_v10  ;;  %v4376_v12 = vpop.f32.mrb[41].mxu0 }
 0x8ba   : > { %v4377_v55 = vadd.f32 %v6863_v10, %v4376_v12 }
 0x8bb   : > { %v4448_v8 = vadd.f32 %v4382_v51, %v6539_v18 }
 0x8bc   : > { %v4447_v43 = vadd.f32 %v4377_v55, %v6534_v22 }
 0x8bd   : > { %4464 = vst.msk [vmem:[%s6871_s30 + $0x18] sm:$0xff] %vm398_vm0, %v4448_v8 }
 0x8be   : > { %4463 = vst.msk [vmem:[%s6871_s30 + $0x10] sm:$0xff] %vm398_vm0, %v4447_v43 }
 0x8cd   : > { %v5058_v28 = vpop.f32.mrb[42].mxu0 }
 0x8ce   : > { %v4392_v30 = vadd.f32 %v5058_v28, %v6863_v10  ;;  %v4386_v57 = vpop.f32.mrb[43].mxu0 }
 0x8cf   : > { %v4387_v29 = vadd.f32 %v6863_v10, %v4386_v57 }
 0x8d0   : > { %v4450_v16 = vadd.f32 %v4392_v30, %v6554_v24 }
 0x8d1   : > { %v4449_v5 = vadd.f32 %v4387_v29, %v6544_v49 }
 0x8d2   : > { %4466 = vst.msk [vmem:[%s6871_s30 + $0x28] sm:$0xff] %vm398_vm0, %v4450_v16 }
 0x8d3   : > { %4465 = vst.msk [vmem:[%s6871_s30 + $0x20] sm:$0xff] %vm398_vm0, %v4449_v5 }
 0x8d8   : > { %v5061_v22 = vpop.f32.mrb[44].mxu0 }
 0x8d9   : > { %v4402_v18 = vadd.f32 %v5061_v22, %v6863_v10  ;;  %v4396_v62 = vpop.f32.mrb[45].mxu0 }
 0x8da   : > { %v4397_v59 = vadd.f32 %v6863_v10, %v4396_v62 }
 0x8db   : > { %v4452_v23 = vadd.f32 %v4402_v18, %v6559_v35 }
 0x8dc   : > { %v4451_v20 = vadd.f32 %v4397_v59, %v6549_v32  ;;  %v5064_v11 = vpop.f32.mrb[46].mxu0 }
 0x8dd   : > { %4468 = vst.msk [vmem:[%s6871_s30 + $0x38] sm:$0xff] %vm398_vm0, %v4452_v23  ;;  %v4412_v49 = vadd.f32 %v5064_v11, %v6863_v10  ;;  %v4406_v24 = vpop.f32.mrb[47].mxu0 }
 0x8de   : > { %4467 = vst.msk [vmem:[%s6871_s30 + $0x30] sm:$0xff] %vm398_vm0, %v4451_v20  ;;  %v4407_v13 = vadd.f32 %v6863_v10, %v4406_v24 }
 0x8df   : > { %v4454_v38 = vadd.f32 %v4412_v49, %v6569_v53 }
 0x8e0   : > { %v4453_v45 = vadd.f32 %v4407_v13, %v6562_v9  ;;  %v5067_v31 = vpop.f32.mrb[48].mxu0 }
 0x8e1   : > { %4470 = vst.msk [vmem:[%s6871_s30 + $0x48] sm:$0xff] %vm398_vm0, %v4454_v38  ;;  %v4422_v32 = vadd.f32 %v5067_v31, %v6863_v10  ;;  %v4416_v35 = vpop.f32.mrb[49].mxu0 }
 0x8e2   : > { %4469 = vst.msk [vmem:[%s6871_s30 + $0x40] sm:$0xff] %vm398_vm0, %v4453_v45  ;;  %v4417_v37 = vadd.f32 %v6863_v10, %v4416_v35 }
 0x8e3   : > { %v4456_v47 = vadd.f32 %v4422_v32, %v6579_v36 }
 0x8e4   : > { %v4455_v53 = vadd.f32 %v4417_v37, %v6572_v6  ;;  %v5070_v44 = vpop.f32.mrb[50].mxu0 }
 0x8e5   : > { %4472 = vst.msk [vmem:[%s6871_s30 + $0x58] sm:$0xff] %vm398_vm0, %v4456_v47  ;;  %v4432_v9 = vadd.f32 %v5070_v44, %v6863_v10  ;;  %v4426_v27 = vpop.f32.mrb[51].mxu0 }
 0x8e6   : > { %4471 = vst.msk [vmem:[%s6871_s30 + $0x50] sm:$0xff] %vm398_vm0, %v4455_v53  ;;  %v4427_v61 = vadd.f32 %v6863_v10, %v4426_v27 }
 0x8e7   : > { %v4458_v48 = vadd.f32 %v4432_v9, %v6589_v2 }
 0x8e8   : > { %v4457_v0 = vadd.f32 %v4427_v61, %v6582_v4 }
 0x8e9   : > { %4474 = vst.msk [vmem:[%s6871_s30 + $0x68] sm:$0xff] %vm398_vm0, %v4458_v48 }
 0x8ea   : > { %4473 = vst.msk [vmem:[%s6871_s30 + $0x60] sm:$0xff] %vm398_vm0, %v4457_v0 }
 0x90e   : > { %v5073_v6 = vpop.f32.mrb[52].mxu0 }
 0x90f   : > { %v4442_v36 = vadd.f32 %v5073_v6, %v6863_v10  ;;  %v4436_v21 = vpop.f32.mrb[53].mxu0 }
 0x910   : > { %v4437_v34 = vadd.f32 %v6863_v10, %v4436_v21 }
 0x911   : > { %v4460_v56 = vadd.f32 %v4442_v36, %v6594_v54 }
 0x912   : > { %v4459_v4 = vadd.f32 %v4437_v34, %v6599_v40 }
 0x913   : > { %4476 = vst.msk [vmem:[%s6871_s30 + $0x78] sm:$0xff] %vm398_vm0, %v4460_v56 }
 0x914   : > { %4475 = vst.msk [vmem:[%s6871_s30 + $0x70] sm:$0xff] %vm398_vm0, %v4459_v4 }
 0x915   : > { %5415 = shalt.err (!%p5412_p2)
}
 0x916   : > { %s5416_s11 = scalar_lea.hbm %s6933_s24, 2048  ;;  %s5420_s28 = scalar_lea.hbm %s6994_s10, 4096 }
 0x917   : > { %p5417_p4 = scmp.ne.s32.totalorder %s6933_s24, %s5416_s11  ;;  %p5421_p9 = scmp.lt.u32.totalorder %s6933_s24, %s6994_s10 }
 0x918   : > { %p5422_p1 = scmp.lt.u32.totalorder %s5420_s28, %s5416_s11  ;;  %p5424_p6 = scmp.lt.u32.totalorder %s5416_s11, %s6933_s24 }
 0x919   : > { %p5418_p5 = pnand %p5417_p4, %p7002_p11 }
 0x91a   : > { %p5423_p3 = por %p5422_p1, %p5421_p9 }
 0x91b   : > { %p5419_p7 = pneg %p5418_p5 }
 0x91c   : > { %p5425_p12 = por %p5424_p6, %p5423_p3 }
 0x91e   : > { %p5426_p13 = pnand %p5425_p12, %p5419_p7 }
 0x920   : > { %5429 = shalt.err (!%p5426_p13)
}
 0x921   : > { %s5478_s12 = smov 128   ;;  %s5479_s21 = smov 8  }
 0x922   : > { %5112 = dma.vmem_to_hbm [thread:$0]  (%p7002_p11), %s6935_s29, 2048, %s6933_s24, %s4478_s17, %s5478_s12, %s5478_s12, %s5479_s21  }
 0x923 PF: > { %s4506_s23 = sand.u32 1, %s5456_s13   ;;  %p7003_p8 = scmp.ne.s32.totalorder %s7000_s26, 0 }
 0x924   : > { %p7004_p10 = scmp.ge.s32.totalorder %s5468_s16, 2  ;;  %s4507_s11 = scalar_lea.sflag [#allocation4], %s4506_s23 }
 0x926   : > { %p5119_p0 = pnand %p7004_p10, %p7003_p8 }
 0x928   : > { %5451 = dma.done.wait (!%p5119_p0), %s4507_s11, 2048  }
 0x929   : > { %5453 = vsyncadd (!%p5119_p0), %s4507_s11, 4294965248  ;;  %s7005_s30 = sld [smem:[#allocation8_spill]]  ;;  %p23_p2 = scmp.ge.s32.totalorder %s5560_s19, 4  }
 0x92a   : > { %s7006_s13 = smov %s5460_s14  ;;  %s7007_s14 = smov %s5464_s15 }
 0x92b   : > { %s7009_s16 = smov %s5560_s19  ;;  %25 = sbr.rel (!%p23_p2) target bundleno = 5 (0x5), region = 105 }
 0x92f   : > { %s7008_s15 = smov %s7005_s30 }
 0x932   :  { %4512 = vsyncpa [#allocation3], 1 }
 0x933   :  { %4514 = vsyncpa [#allocation3 + $0x1], 1 }
 0x934   :  { %4515 = vsyncpa [#allocation4], 1 }
 0x935   :  { %4517 = vsyncpa [#allocation4 + $0x1], 1 }

</bundles_post_ra>
